<compile_context>
chip_gen: v5e
topology: v5e:2x2
jax: 0.10.0
libtpu: 0.0.40
codegen_flags: <defaults>
</compile_context>

<pallas_src>
from functools import partial

import jax
import jax.numpy as jnp
from jax.experimental import pallas as pl
from jax.experimental.pallas import tpu as pltpu

BN_EPS = 1e-5
LN_EPS = 1e-5
LANE = 128


def _round_up(n, m):
    return ((n + m - 1) // m) * m


def _pad_to(a, shape):
    return jnp.pad(a, [(0, t - s) for s, t in zip(a.shape, shape)])


def _sublane(itemsize):
    return {4: 8, 2: 16, 1: 32}.get(itemsize, 8)


# ---------------------------------------------------------------------------
# Kernel
# ---------------------------------------------------------------------------
def _enhanced_server_kernel(num_hidden, hidden_true_dims, s_total, tile_s, needs_mask,
                            x_ref, *refs):
    # refs layout: [wp, bp] + [w_i, b_i, ln_g_i, ln_b_i]*num_hidden + [wo, bo],
    # then out_ref, then acc_ref (per-lane f32 pooling accumulator scratch).
    acc_ref = refs[-1]
    out_ref = refs[-2]
    p = refs[:-2]

    s = pl.program_id(1)

    @pl.when(s == 0)
    def _():
        acc_ref[...] = jnp.zeros_like(acc_ref)

    # ---- streaming global-average-pool: per-lane partial sums on the VPU ----
    # (single cross-lane reduce deferred to the finalize -> XLU stays off the
    #  per-byte critical path, which matters at v7x HBM bandwidth)
    n_chunks = tile_s // LANE
    rem = tile_s - n_chunks * LANE
    if needs_mask:
        lane_iota = jax.lax.broadcasted_iota(jnp.int32, acc_ref.shape, 2)
        base = s * tile_s
    for j in range(n_chunks):
        c = x_ref[:, :, j * LANE:(j + 1) * LANE].astype(jnp.float32)
        if needs_mask:
            # Ragged spatial tail: Pallas partial blocks hold unspecified padding,
            # so it MUST be zeroed before entering the reduction.
            c = jnp.where(base + j * LANE + lane_iota < s_total, c, 0.0)
        acc_ref[...] += c
    if rem > 0:
        # Only reachable when tile_s == S (single spatial step) -> never masked.
        tail = x_ref[:, :, n_chunks * LANE:tile_s].astype(jnp.float32)
        acc_ref[:, :, 0:1] += jnp.sum(tail, axis=-1, keepdims=True)

    @pl.when(s == pl.num_programs(1) - 1)
    def _():
        # One cross-lane reduction of the pooling partials per batch tile.
        feat = jnp.sum(acc_ref[...], axis=-1)          # (tile_b, C), f32

        # --- AdaptiveFeatureProjection (Linear + folded BN + 1/HW) + LeakyReLU(0.1)
        wp, bp = p[0], p[1]
        h = jnp.dot(feat, wp[...], preferred_element_type=jnp.float32) + bp[...]
        h = jnp.where(h > 0, h, 0.1 * h)
        # Dropout(0.3) -> identity in eval mode

        # --- UnifiedClassifier hidden blocks: Linear -> LayerNorm -> ReLU ---
        idx = 2
        for li in range(num_hidden):
            w, b, lg, lb = p[idx:idx + 4]
            idx += 4
            d_true = int(hidden_true_dims[li])
            d_pad = int(w.shape[1])
            inv_d = 1.0 / float(d_true)
            h = jnp.dot(h, w[...], preferred_element_type=jnp.float32) + b[...]
            # Padded lanes of h are exactly 0 (zero-padded weights/bias), so the
            # full-lane sum equals the true-lane sum; divide by the true width.
            mu = jnp.sum(h, axis=-1, keepdims=True) * inv_d
            diff = h - mu
            if d_pad != d_true:
                # Two-pass variance needs the padded lanes (which hold -mu after
                # centering) zeroed out.
                lmask = jax.lax.broadcasted_iota(jnp.int32, (1, d_pad), 1) < d_true
                diff = jnp.where(lmask, diff, 0.0)
            var = jnp.sum(diff * diff, axis=-1, keepdims=True) * inv_d
            # gamma/beta are zero in padded lanes -> padded lanes stay 0.
            h = diff * jax.lax.rsqrt(var + LN_EPS) * lg[...] + lb[...]
            h = jnp.maximum(h, 0.0)
            # Dropout(0.5) -> identity in eval mode

        # --- final classification Linear (lane-padded; wrapper slices back) ---
        wo, bo = p[idx], p[idx + 1]
        out = jnp.dot(h, wo[...], preferred_element_type=jnp.float32) + bo[...]
        out_ref[...] = out.astype(out_ref.dtype)


# ---------------------------------------------------------------------------
# Offline parameter preparation: fold BN + pooling scale, pad lane dims to 128
# ---------------------------------------------------------------------------
def prepare_params(params, *, hidden_dims, num_classes, hw):
    wp, bp, bn_g, bn_b, bn_mu, bn_var = params[0:6]
    scale = bn_g * jax.lax.rsqrt(bn_var + BN_EPS)          # (1, T)
    wp_f = wp * scale / float(hw)                          # fold BN scale + 1/(H*W)
    bp_f = (bp - bn_mu) * scale + bn_b

    t_pad = _round_up(wp.shape[1], LANE)
    kparams = [_pad_to(wp_f, (wp.shape[0], t_pad)), _pad_to(bp_f, (1, t_pad))]

    prev_pad = t_pad
    idx = 6
    for dim in hidden_dims:
        w, b, lg, lb = params[idx:idx + 4]
        idx += 4
        d_pad = _round_up(dim, LANE)
        kparams += [_pad_to(w, (prev_pad, d_pad)), _pad_to(b, (1, d_pad)),
                    _pad_to(lg, (1, d_pad)), _pad_to(lb, (1, d_pad))]
        prev_pad = d_pad

    wo, bo = params[idx], params[idx + 1]
    n_pad = _round_up(num_classes, LANE)
    kparams += [_pad_to(wo, (prev_pad, n_pad)), _pad_to(bo, (1, n_pad))]
    return tuple(kparams)


# ---------------------------------------------------------------------------
# Tiling: VMEM-budget formula (accounts for sublane padding of C, the double
# buffer, and the per-lane accumulator scratch)
# ---------------------------------------------------------------------------
def _choose_tiles(B, C, S, itemsize, vmem_cap, max_tile_s):
    c_x = _round_up(C, _sublane(itemsize))     # streamed x-buffer sublane padding
    c_acc = _round_up(C, 8)                    # f32 accumulator sublane padding
    x_budget = min(24 << 20, max(4 << 20, vmem_cap // 3))

    # Batch tile: multiple of 8, >= 2 tiles when B > 8 (v7x megacore), cap 128.
    tile_b = B if B <= 8 else min(_round_up(pl.cdiv(B, 2), 8), 128)

    def need(tb, ts):
        return tb * c_acc * LANE * 4 + 2 * tb * c_x * ts * itemsize

    while tile_b > 8 and need(tile_b, min(S, LANE)) > x_budget:
        tile_b -= 8

    acc_bytes = tile_b * c_acc * LANE * 4
    per_elem = max(1, 2 * tile_b * c_x * itemsize)
    fit_ts = max(LANE, ((x_budget - acc_bytes) // per_elem) // LANE * LANE)
    fit_ts = min(fit_ts, max(LANE, (max_tile_s // LANE) * LANE))
    tile_s = S if S <= fit_ts else fit_ts      # full-dim block is always legal
    return tile_b, tile_s


# ---------------------------------------------------------------------------
# Wrapper
# ---------------------------------------------------------------------------
@partial(jax.jit, static_argnames=("hidden_dims", "num_classes",
                                   "single_buffer_params", "max_tile_s"))
def _forward(x_nchw, kparams, hidden_dims, num_classes,
             single_buffer_params, max_tile_s):
    B, C, H, W = x_nchw.shape
    S = H * W
    itemsize = x_nchw.dtype.itemsize
    num_hidden = len(hidden_dims)
    n_pad = _round_up(num_classes, LANE)

    # Metadata-only reshape; x is streamed in its native dtype (no HBM pre-pass).
    x = x_nchw.reshape(B, C, S)

    try:
        vmem_cap = int(pltpu.get_tpu_info().vmem_capacity_bytes)
    except Exception:
        vmem_cap = 64 << 20                    # conservative (v7x per-core VMEM)

    tile_b, tile_s = _choose_tiles(B, C, S, itemsize, vmem_cap, max_tile_s)
    n_bt = pl.cdiv(B, tile_b)
    n_st = pl.cdiv(S, tile_s)
    b_out = n_bt * tile_b                      # fresh output rows; sliced back to B
    needs_mask = (S % tile_s) != 0             # ragged spatial tail masked in-kernel

    x_spec = pl.BlockSpec((tile_b, C, tile_s), lambda i, s: (i, 0, s))
    # Constant index_map -> parameters stay VMEM-resident across all grid steps;
    # Buffered(1) avoids the default double-buffer copy of every weight.
    pmode = dict(pipeline_mode=pl.Buffered(1)) if single_buffer_params else {}
    w_specs = [pl.BlockSpec(p.shape, lambda i, s: (0, 0), **pmode) for p in kparams]
    out_spec = pl.BlockSpec((tile_b, n_pad), lambda i, s: (i, 0))

    # VMEM limit from what this configuration actually needs (+ headroom).
    param_bytes = sum(int(p.size) * p.dtype.itemsize for p in kparams)
    max_feat = max(int(p.shape[-1]) for p in kparams)
    est = ((1 if single_buffer_params else 2) * param_bytes
           + 2 * tile_b * _round_up(C, _sublane(itemsize)) * tile_s * itemsize
           + tile_b * _round_up(C, 8) * LANE * 4
           + 2 * tile_b * n_pad * 4
           + 6 * tile_b * max_feat * 4
           + (4 << 20))
    vmem_limit = int(min(max(est * 5 // 4, 32 << 20), max((vmem_cap * 3) // 4, 32 << 20)))

    # Advisory cost estimate (pool adds + matmul flops), native-dtype byte count.
    matmul_flops = 2 * B * sum(int(p.shape[0]) * int(p.shape[1])
                               for p in kparams if p.shape[0] > 1)
    cost = pl.CostEstimate(
        flops=int(matmul_flops + B * C * S),
        transcendentals=int(B * max(num_hidden, 1)),
        bytes_accessed=int(x.size * itemsize + param_bytes + B * n_pad * 4))

    out = pl.pallas_call(
        partial(_enhanced_server_kernel, num_hidden, tuple(hidden_dims),
                S, tile_s, needs_mask),
        out_shape=jax.ShapeDtypeStruct((b_out, n_pad), jnp.float32),
        grid_spec=pltpu.PrefetchScalarGridSpec(
            num_scalar_prefetch=0,
            grid=(n_bt, n_st),
            in_specs=[x_spec] + w_specs,
            out_specs=out_spec,
            scratch_shapes=[pltpu.VMEM((tile_b, C, LANE), jnp.float32)],
        ),
        compiler_params=pltpu.CompilerParams(
            dimension_semantics=("parallel", "arbitrary"),
            vmem_limit_bytes=vmem_limit,
        ),
        cost_estimate=cost,
    )(x, *kparams)

    return out[:B, :num_classes]


def enhanced_server_model(x_nchw, kparams, *, hidden_dims, num_classes, max_tile_s=8192):
    """Fused EnhancedServerModel forward (eval mode).

    Tries single-buffered (VMEM-resident) parameters first; falls back to the
    default pipelining if this Pallas build rejects pipeline_mode=Buffered(1).
    """
    hd = tuple(int(d) for d in hidden_dims)
    try:
        return _forward(x_nchw, kparams, hidden_dims=hd, num_classes=int(num_classes),
                        single_buffer_params=True, max_tile_s=int(max_tile_s))
    except Exception:
        return _forward(x_nchw, kparams, hidden_dims=hd, num_classes=int(num_classes),
                        single_buffer_params=False, max_tile_s=int(max_tile_s))


# ---------------------------------------------------------------------------
# Synthetic init (matches PyTorch module shapes) + pure-JAX reference
# ---------------------------------------------------------------------------
def init_params(key, input_dim, target_dim, hidden_dims, num_classes):
    keys = jax.random.split(key, 6 + len(hidden_dims) + 1)
    params = []

    # AdaptiveFeatureProjection: Linear(input_dim, target_dim) + BatchNorm1d(target_dim)
    bound = 1.0 / jnp.sqrt(jnp.float32(input_dim))
    wp = jax.random.uniform(keys[0], (input_dim, target_dim), jnp.float32, -bound, bound)
    bp = jax.random.uniform(keys[1], (1, target_dim), jnp.float32, -bound, bound)
    # Non-trivial affine + running stats so the eval-mode BN folding is exercised.
    bn_gamma = 1.0 + 0.1 * jax.random.normal(keys[2], (1, target_dim), jnp.float32)
    bn_beta = 0.05 * jax.random.normal(keys[3], (1, target_dim), jnp.float32)
    bn_mean = 0.1 * jax.random.normal(keys[4], (1, target_dim), jnp.float32)
    bn_var = jax.random.uniform(keys[5], (1, target_dim), jnp.float32, 0.5, 1.5)
    params += [wp, bp, bn_gamma, bn_beta, bn_mean, bn_var]

    # UnifiedClassifier hidden blocks: kaiming_normal (fan_out) weights, zero bias
    prev = target_dim
    for i, dim in enumerate(hidden_dims):
        std = jnp.sqrt(2.0 / jnp.float32(dim))          # fan_out mode
        w = std * jax.random.normal(keys[6 + i], (prev, dim), jnp.float32)
        b = jnp.zeros((1, dim), jnp.float32)
        ln_g = jnp.ones((1, dim), jnp.float32)
        ln_b = jnp.zeros((1, dim), jnp.float32)
        params += [w, b, ln_g, ln_b]
        prev = dim

    # Final Linear(prev, num_classes)
    std = jnp.sqrt(2.0 / jnp.float32(num_classes))
    wo = std * jax.random.normal(keys[-1], (prev, num_classes), jnp.float32)
    bo = jnp.zeros((1, num_classes), jnp.float32)
    params += [wo, bo]
    return tuple(params)


def reference_forward(x_nchw, params, num_hidden):
    """Pure-JAX reference of the same eval-mode forward (unfolded, unpadded)."""
    wp, bp, bn_g, bn_b, bn_mu, bn_var = params[0:6]
    feat = jnp.mean(x_nchw, axis=(2, 3))
    h = feat @ wp + bp
    h = (h - bn_mu) / jnp.sqrt(bn_var + BN_EPS) * bn_g + bn_b
    h = jnp.where(h > 0, h, 0.1 * h)
    idx = 6
    for _ in range(num_hidden):
        w, b, lg, lb = params[idx:idx + 4]
        idx += 4
        h = h @ w + b
        mu = jnp.mean(h, axis=-1, keepdims=True)
        var = jnp.mean((h - mu) ** 2, axis=-1, keepdims=True)
        h = (h - mu) / jnp.sqrt(var + LN_EPS) * lg + lb
        h = jnp.maximum(h, 0.0)
    wo, bo = params[idx], params[idx + 1]
    return h @ wo + bo


if __name__ == "__main__":
    def run_case(key, B, C, H, W, target_dim, hidden_dims, num_classes, max_tile_s=8192):
        kx, kp = jax.random.split(key)
        x = jax.random.normal(kx, (B, C, H, W), jnp.float32)
        params = init_params(kp, C, target_dim, hidden_dims, num_classes)
        kparams = prepare_params(params, hidden_dims=hidden_dims,
                                 num_classes=num_classes, hw=H * W)
        logits = enhanced_server_model(x, kparams, hidden_dims=hidden_dims,
                                       num_classes=num_classes, max_tile_s=max_tile_s)
        logits = jax.block_until_ready(logits)
        ref = reference_forward(x, params, len(hidden_dims))
        assert logits.shape == (B, num_classes)
        err = float(jnp.max(jnp.abs(logits - ref)))
        assert jnp.allclose(logits, ref, atol=2e-3, rtol=2e-3), f"max abs err {err}"
        return logits

    root = jax.random.PRNGKey(0)
    k1, k2, k3 = jax.random.split(root, 3)

    # 1) main case: B=2, C=4, 16x16 spatial, target 32, hidden (32,16), 10 classes
    run_case(k1, 2, 4, 16, 16, 32, (32, 16), 10)
    # 2) ragged batch (B=10 -> two batch tiles of 8) and non-128 spatial (7x7)
    run_case(k2, 10, 6, 7, 7, 24, (24,), 5)
    # 3) ragged spatial tail: S=300 streamed in 128-wide tiles (in-kernel mask path)
    run_case(k3, 2, 4, 15, 20, 32, (32, 16), 10, max_tile_s=128)

    print("KERNEL_OK")
</pallas_src>

<mosaic_0001>
module attributes {stable_mosaic.version = 11 : i64} {
  func.func @_enhanced_server_kernel(%arg0: i32, %arg1: i32, %arg2: memref<2x4x256xf32, #tpu.memory_space<vmem>>, %arg3: memref<4x128xf32, #tpu.memory_space<vmem>>, %arg4: memref<1x128xf32, #tpu.memory_space<vmem>>, %arg5: memref<128x128xf32, #tpu.memory_space<vmem>>, %arg6: memref<1x128xf32, #tpu.memory_space<vmem>>, %arg7: memref<1x128xf32, #tpu.memory_space<vmem>>, %arg8: memref<1x128xf32, #tpu.memory_space<vmem>>, %arg9: memref<128x128xf32, #tpu.memory_space<vmem>>, %arg10: memref<1x128xf32, #tpu.memory_space<vmem>>, %arg11: memref<1x128xf32, #tpu.memory_space<vmem>>, %arg12: memref<1x128xf32, #tpu.memory_space<vmem>>, %arg13: memref<128x128xf32, #tpu.memory_space<vmem>>, %arg14: memref<1x128xf32, #tpu.memory_space<vmem>>, %arg15: memref<2x128xf32, #tpu.memory_space<vmem>>, %arg16: memref<2x4x128xf32, #tpu.memory_space<vmem>>) attributes {dimension_semantics = [#tpu.dimension_semantics<parallel>, #tpu.dimension_semantics<arbitrary>], iteration_bounds = array<i64: 1, 1>, scalar_prefetch = 0 : i64, scratch_operands = 1 : i64, tpu.core_type = #tpu.core_type<tc>, window_params = [{transform_indices = @transform_0, window_bounds = array<i64: 2, 4, 256>}, {pipeline_mode = #tpu.pipeline_mode<synchronous>, transform_indices = @transform_1, window_bounds = array<i64: 4, 128>}, {pipeline_mode = #tpu.pipeline_mode<synchronous>, transform_indices = @transform_2, window_bounds = array<i64: 1, 128>}, {pipeline_mode = #tpu.pipeline_mode<synchronous>, transform_indices = @transform_3, window_bounds = array<i64: 128, 128>}, {pipeline_mode = #tpu.pipeline_mode<synchronous>, transform_indices = @transform_4, window_bounds = array<i64: 1, 128>}, {pipeline_mode = #tpu.pipeline_mode<synchronous>, transform_indices = @transform_5, window_bounds = array<i64: 1, 128>}, {pipeline_mode = #tpu.pipeline_mode<synchronous>, transform_indices = @transform_6, window_bounds = array<i64: 1, 128>}, {pipeline_mode = #tpu.pipeline_mode<synchronous>, transform_indices = @transform_7, window_bounds = array<i64: 128, 128>}, {pipeline_mode = #tpu.pipeline_mode<synchronous>, transform_indices = @transform_8, window_bounds = array<i64: 1, 128>}, {pipeline_mode = #tpu.pipeline_mode<synchronous>, transform_indices = @transform_9, window_bounds = array<i64: 1, 128>}, {pipeline_mode = #tpu.pipeline_mode<synchronous>, transform_indices = @transform_10, window_bounds = array<i64: 1, 128>}, {pipeline_mode = #tpu.pipeline_mode<synchronous>, transform_indices = @transform_11, window_bounds = array<i64: 128, 128>}, {pipeline_mode = #tpu.pipeline_mode<synchronous>, transform_indices = @transform_12, window_bounds = array<i64: 1, 128>}, {transform_indices = @transform_13, window_bounds = array<i64: 2, 128>}]} {
    %c0_i32 = arith.constant 0 : i32
    %0 = arith.cmpi eq, %arg1, %c0_i32 : i32
    %1 = arith.extui %0 : i1 to i32
    %c0_i32_0 = arith.constant 0 : i32
    %2 = arith.cmpi ne, %1, %c0_i32_0 : i32
    scf.if %2 {
      %cst = arith.constant 0.000000e+00 : f32
      %14 = vector.broadcast %cst : f32 to vector<2x4x128xf32>
      %c0_19 = arith.constant 0 : index
      %c0_20 = arith.constant 0 : index
      %c0_21 = arith.constant 0 : index
      %15 = vector.load %arg16[%c0_19, %c0_20, %c0_21] : memref<2x4x128xf32, #tpu.memory_space<vmem>>, vector<2x4x128xf32>
      tpu.vector_store %arg16[%c0_19, %c0_20, %c0_21], %14 {strides = array<i32>} : memref<2x4x128xf32, #tpu.memory_space<vmem>>, vector<2x4x128xf32>,
    } else {
    }
    %c0 = arith.constant 0 : index
    %c0_1 = arith.constant 0 : index
    %c0_2 = arith.constant 0 : index
    %3 = vector.load %arg2[%c0, %c0_1, %c0_2] : memref<2x4x256xf32, #tpu.memory_space<vmem>>, vector<2x4x128xf32>
    %c0_3 = arith.constant 0 : index
    %c0_4 = arith.constant 0 : index
    %c0_5 = arith.constant 0 : index
    %4 = vector.load %arg16[%c0_3, %c0_4, %c0_5] : memref<2x4x128xf32, #tpu.memory_space<vmem>>, vector<2x4x128xf32>
    %5 = arith.addf %4, %3 : vector<2x4x128xf32>
    %c0_6 = arith.constant 0 : index
    %c0_7 = arith.constant 0 : index
    %c0_8 = arith.constant 0 : index
    %6 = vector.load %arg16[%c0_6, %c0_7, %c0_8] : memref<2x4x128xf32, #tpu.memory_space<vmem>>, vector<2x4x128xf32>
    tpu.vector_store %arg16[%c0_6, %c0_7, %c0_8], %5 {strides = array<i32>} : memref<2x4x128xf32, #tpu.memory_space<vmem>>, vector<2x4x128xf32>,
    %c0_9 = arith.constant 0 : index
    %c0_10 = arith.constant 0 : index
    %c128 = arith.constant 128 : index
    %7 = vector.load %arg2[%c0_9, %c0_10, %c128] : memref<2x4x256xf32, #tpu.memory_space<vmem>>, vector<2x4x128xf32>
    %c0_11 = arith.constant 0 : index
    %c0_12 = arith.constant 0 : index
    %c0_13 = arith.constant 0 : index
    %8 = vector.load %arg16[%c0_11, %c0_12, %c0_13] : memref<2x4x128xf32, #tpu.memory_space<vmem>>, vector<2x4x128xf32>
    %9 = arith.addf %8, %7 : vector<2x4x128xf32>
    %c0_14 = arith.constant 0 : index
    %c0_15 = arith.constant 0 : index
    %c0_16 = arith.constant 0 : index
    %10 = vector.load %arg16[%c0_14, %c0_15, %c0_16] : memref<2x4x128xf32, #tpu.memory_space<vmem>>, vector<2x4x128xf32>
    tpu.vector_store %arg16[%c0_14, %c0_15, %c0_16], %9 {strides = array<i32>} : memref<2x4x128xf32, #tpu.memory_space<vmem>>, vector<2x4x128xf32>,
    %c0_i32_17 = arith.constant 0 : i32
    %11 = arith.cmpi eq, %arg1, %c0_i32_17 : i32
    %12 = arith.extui %11 : i1 to i32
    %c0_i32_18 = arith.constant 0 : i32
    %13 = arith.cmpi ne, %12, %c0_i32_18 : i32
    scf.if %13 {
      %c0_19 = arith.constant 0 : index
      %c0_20 = arith.constant 0 : index
      %c0_21 = arith.constant 0 : index
      %14 = vector.load %arg16[%c0_19, %c0_20, %c0_21] : memref<2x4x128xf32, #tpu.memory_space<vmem>>, vector<2x4x128xf32>
      %cst = arith.constant dense<0.000000e+00> : vector<2x4xf32>
      %15 = vector.multi_reduction <add>, %14, %cst [2] : vector<2x4x128xf32> to vector<2x4xf32>
      %c0_22 = arith.constant 0 : index
      %c0_23 = arith.constant 0 : index
      %16 = vector.load %arg3[%c0_22, %c0_23] : memref<4x128xf32, #tpu.memory_space<vmem>>, vector<4x128xf32>
      %cst_24 = arith.constant dense<0.000000e+00> : vector<2x128xf32>
      %17 = tpu.matmul %15, %16, %cst_24 {dimension_numbers = #tpu.dot_dimension_numbers<[1], [0], [0], [1], [0, 0, 1, 1], [], []>} : vector<2x4xf32>, vector<4x128xf32>, vector<2x128xf32> -> vector<2x128xf32>
      %c0_25 = arith.constant 0 : index
      %c0_26 = arith.constant 0 : index
      %18 = vector.load %arg4[%c0_25, %c0_26] : memref<1x128xf32, #tpu.memory_space<vmem>>, vector<1x128xf32>
      %19 = vector.broadcast %18 : vector<1x128xf32> to vector<2x128xf32>
      %20 = arith.addf %17, %19 : vector<2x128xf32>
      %cst_27 = arith.constant 0.000000e+00 : f32
      %21 = vector.broadcast %cst_27 : f32 to vector<2x128xf32>
      %22 = arith.cmpf ogt, %20, %21 : vector<2x128xf32>
      %cst_28 = arith.constant 1.000000e-01 : f32
      %23 = vector.broadcast %cst_28 : f32 to vector<2x128xf32>
      %24 = arith.mulf %23, %20 : vector<2x128xf32>
      %25 = arith.select %22, %20, %24 : vector<2x128xi1>, vector<2x128xf32>
      %c0_29 = arith.constant 0 : index
      %c0_30 = arith.constant 0 : index
      %26 = vector.load %arg5[%c0_29, %c0_30] : memref<128x128xf32, #tpu.memory_space<vmem>>, vector<128x128xf32>
      %cst_31 = arith.constant dense<0.000000e+00> : vector<2x128xf32>
      %27 = tpu.matmul %25, %26, %cst_31 {dimension_numbers = #tpu.dot_dimension_numbers<[1], [0], [0], [1], [0, 0, 1, 1], [], []>} : vector<2x128xf32>, vector<128x128xf32>, vector<2x128xf32> -> vector<2x128xf32>
      %c0_32 = arith.constant 0 : index
      %c0_33 = arith.constant 0 : index
      %28 = vector.load %arg6[%c0_32, %c0_33] : memref<1x128xf32, #tpu.memory_space<vmem>>, vector<1x128xf32>
      %29 = vector.broadcast %28 : vector<1x128xf32> to vector<2x128xf32>
      %30 = arith.addf %27, %29 : vector<2x128xf32>
      %cst_34 = arith.constant dense<0.000000e+00> : vector<2xf32>
      %31 = vector.multi_reduction <add>, %30, %cst_34 [1] : vector<2x128xf32> to vector<2xf32>
      %32 = vector.shape_cast %31 : vector<2xf32> to vector<2x1xf32>
      %cst_35 = arith.constant 3.125000e-02 : f32
      %33 = vector.broadcast %cst_35 : f32 to vector<2x1xf32>
      %34 = arith.mulf %32, %33 : vector<2x1xf32>
      %35 = vector.broadcast %34 : vector<2x1xf32> to vector<2x128xf32>
      %36 = arith.subf %30, %35 : vector<2x128xf32>
      %37 = tpu.iota {dimensions = array<i32: 1>} : vector<1x128xi32>
      %c32_i32 = arith.constant 32 : i32
      %38 = vector.broadcast %c32_i32 : i32 to vector<1x128xi32>
      %39 = arith.cmpi slt, %37, %38 : vector<1x128xi32>
      %cst_36 = arith.constant 0.000000e+00 : f32
      %40 = vector.shape_cast %39 : vector<1x128xi1> to vector<1x128xi1>
      %41 = vector.broadcast %40 : vector<1x128xi1> to vector<2x128xi1>
      %42 = vector.broadcast %cst_36 : f32 to vector<2x128xf32>
      %43 = arith.select %41, %36, %42 : vector<2x128xi1>, vector<2x128xf32>
      %44 = arith.mulf %43, %43 : vector<2x128xf32>
      %cst_37 = arith.constant dense<0.000000e+00> : vector<2xf32>
      %45 = vector.multi_reduction <add>, %44, %cst_37 [1] : vector<2x128xf32> to vector<2xf32>
      %46 = vector.shape_cast %45 : vector<2xf32> to vector<2x1xf32>
      %cst_38 = arith.constant 3.125000e-02 : f32
      %47 = vector.broadcast %cst_38 : f32 to vector<2x1xf32>
      %48 = arith.mulf %46, %47 : vector<2x1xf32>
      %cst_39 = arith.constant 9.99999974E-6 : f32
      %49 = vector.broadcast %cst_39 : f32 to vector<2x1xf32>
      %50 = arith.addf %48, %49 : vector<2x1xf32>
      %51 = math.rsqrt %50 : vector<2x1xf32>
      %52 = vector.broadcast %51 : vector<2x1xf32> to vector<2x128xf32>
      %53 = arith.mulf %43, %52 : vector<2x128xf32>
      %c0_40 = arith.constant 0 : index
      %c0_41 = arith.constant 0 : index
      %54 = vector.load %arg7[%c0_40, %c0_41] : memref<1x128xf32, #tpu.memory_space<vmem>>, vector<1x128xf32>
      %55 = vector.broadcast %54 : vector<1x128xf32> to vector<2x128xf32>
      %56 = arith.mulf %53, %55 : vector<2x128xf32>
      %c0_42 = arith.constant 0 : index
      %c0_43 = arith.constant 0 : index
      %57 = vector.load %arg8[%c0_42, %c0_43] : memref<1x128xf32, #tpu.memory_space<vmem>>, vector<1x128xf32>
      %58 = vector.broadcast %57 : vector<1x128xf32> to vector<2x128xf32>
      %59 = arith.addf %56, %58 : vector<2x128xf32>
      %cst_44 = arith.constant 0.000000e+00 : f32
      %60 = vector.broadcast %cst_44 : f32 to vector<2x128xf32>
      %61 = arith.maximumf %59, %60 : vector<2x128xf32>
      %c0_45 = arith.constant 0 : index
      %c0_46 = arith.constant 0 : index
      %62 = vector.load %arg9[%c0_45, %c0_46] : memref<128x128xf32, #tpu.memory_space<vmem>>, vector<128x128xf32>
      %cst_47 = arith.constant dense<0.000000e+00> : vector<2x128xf32>
      %63 = tpu.matmul %61, %62, %cst_47 {dimension_numbers = #tpu.dot_dimension_numbers<[1], [0], [0], [1], [0, 0, 1, 1], [], []>} : vector<2x128xf32>, vector<128x128xf32>, vector<2x128xf32> -> vector<2x128xf32>
      %c0_48 = arith.constant 0 : index
      %c0_49 = arith.constant 0 : index
      %64 = vector.load %arg10[%c0_48, %c0_49] : memref<1x128xf32, #tpu.memory_space<vmem>>, vector<1x128xf32>
      %65 = vector.broadcast %64 : vector<1x128xf32> to vector<2x128xf32>
      %66 = arith.addf %63, %65 : vector<2x128xf32>
      %cst_50 = arith.constant dense<0.000000e+00> : vector<2xf32>
      %67 = vector.multi_reduction <add>, %66, %cst_50 [1] : vector<2x128xf32> to vector<2xf32>
      %68 = vector.shape_cast %67 : vector<2xf32> to vector<2x1xf32>
      %cst_51 = arith.constant 6.250000e-02 : f32
      %69 = vector.broadcast %cst_51 : f32 to vector<2x1xf32>
      %70 = arith.mulf %68, %69 : vector<2x1xf32>
      %71 = vector.broadcast %70 : vector<2x1xf32> to vector<2x128xf32>
      %72 = arith.subf %66, %71 : vector<2x128xf32>
      %73 = tpu.iota {dimensions = array<i32: 1>} : vector<1x128xi32>
      %c16_i32 = arith.constant 16 : i32
      %74 = vector.broadcast %c16_i32 : i32 to vector<1x128xi32>
      %75 = arith.cmpi slt, %73, %74 : vector<1x128xi32>
      %cst_52 = arith.constant 0.000000e+00 : f32
      %76 = vector.shape_cast %75 : vector<1x128xi1> to vector<1x128xi1>
      %77 = vector.broadcast %76 : vector<1x128xi1> to vector<2x128xi1>
      %78 = vector.broadcast %cst_52 : f32 to vector<2x128xf32>
      %79 = arith.select %77, %72, %78 : vector<2x128xi1>, vector<2x128xf32>
      %80 = arith.mulf %79, %79 : vector<2x128xf32>
      %cst_53 = arith.constant dense<0.000000e+00> : vector<2xf32>
      %81 = vector.multi_reduction <add>, %80, %cst_53 [1] : vector<2x128xf32> to vector<2xf32>
      %82 = vector.shape_cast %81 : vector<2xf32> to vector<2x1xf32>
      %cst_54 = arith.constant 6.250000e-02 : f32
      %83 = vector.broadcast %cst_54 : f32 to vector<2x1xf32>
      %84 = arith.mulf %82, %83 : vector<2x1xf32>
      %cst_55 = arith.constant 9.99999974E-6 : f32
      %85 = vector.broadcast %cst_55 : f32 to vector<2x1xf32>
      %86 = arith.addf %84, %85 : vector<2x1xf32>
      %87 = math.rsqrt %86 : vector<2x1xf32>
      %88 = vector.broadcast %87 : vector<2x1xf32> to vector<2x128xf32>
      %89 = arith.mulf %79, %88 : vector<2x128xf32>
      %c0_56 = arith.constant 0 : index
      %c0_57 = arith.constant 0 : index
      %90 = vector.load %arg11[%c0_56, %c0_57] : memref<1x128xf32, #tpu.memory_space<vmem>>, vector<1x128xf32>
      %91 = vector.broadcast %90 : vector<1x128xf32> to vector<2x128xf32>
      %92 = arith.mulf %89, %91 : vector<2x128xf32>
      %c0_58 = arith.constant 0 : index
      %c0_59 = arith.constant 0 : index
      %93 = vector.load %arg12[%c0_58, %c0_59] : memref<1x128xf32, #tpu.memory_space<vmem>>, vector<1x128xf32>
      %94 = vector.broadcast %93 : vector<1x128xf32> to vector<2x128xf32>
      %95 = arith.addf %92, %94 : vector<2x128xf32>
      %cst_60 = arith.constant 0.000000e+00 : f32
      %96 = vector.broadcast %cst_60 : f32 to vector<2x128xf32>
      %97 = arith.maximumf %95, %96 : vector<2x128xf32>
      %c0_61 = arith.constant 0 : index
      %c0_62 = arith.constant 0 : index
      %98 = vector.load %arg13[%c0_61, %c0_62] : memref<128x128xf32, #tpu.memory_space<vmem>>, vector<128x128xf32>
      %cst_63 = arith.constant dense<0.000000e+00> : vector<2x128xf32>
      %99 = tpu.matmul %97, %98, %cst_63 {dimension_numbers = #tpu.dot_dimension_numbers<[1], [0], [0], [1], [0, 0, 1, 1], [], []>} : vector<2x128xf32>, vector<128x128xf32>, vector<2x128xf32> -> vector<2x128xf32>
      %c0_64 = arith.constant 0 : index
      %c0_65 = arith.constant 0 : index
      %100 = vector.load %arg14[%c0_64, %c0_65] : memref<1x128xf32, #tpu.memory_space<vmem>>, vector<1x128xf32>
      %101 = vector.broadcast %100 : vector<1x128xf32> to vector<2x128xf32>
      %102 = arith.addf %99, %101 : vector<2x128xf32>
      %c0_66 = arith.constant 0 : index
      %c0_67 = arith.constant 0 : index
      %103 = vector.load %arg15[%c0_66, %c0_67] : memref<2x128xf32, #tpu.memory_space<vmem>>, vector<2x128xf32>
      tpu.vector_store %arg15[%c0_66, %c0_67], %102 {strides = array<i32>} : memref<2x128xf32, #tpu.memory_space<vmem>>, vector<2x128xf32>,
    } else {
    }
    return
  }
  func.func @transform_0(%arg0: i32, %arg1: i32) -> (i32, i32, i32) {
    %c0_i32 = arith.constant 0 : i32
    %c0_i32_0 = arith.constant 0 : i32
    return %arg0, %c0_i32, %arg1 : i32, i32, i32
  }
  func.func @transform_1(%arg0: i32, %arg1: i32) -> (i32, i32) {
    %c0_i32 = arith.constant 0 : i32
    %c0_i32_0 = arith.constant 0 : i32
    %c0_i32_1 = arith.constant 0 : i32
    return %c0_i32, %c0_i32_0 : i32, i32
  }
  func.func @transform_2(%arg0: i32, %arg1: i32) -> (i32, i32) {
    %c0_i32 = arith.constant 0 : i32
    %c0_i32_0 = arith.constant 0 : i32
    %c0_i32_1 = arith.constant 0 : i32
    return %c0_i32, %c0_i32_0 : i32, i32
  }
  func.func @transform_3(%arg0: i32, %arg1: i32) -> (i32, i32) {
    %c0_i32 = arith.constant 0 : i32
    %c0_i32_0 = arith.constant 0 : i32
    %c0_i32_1 = arith.constant 0 : i32
    return %c0_i32, %c0_i32_0 : i32, i32
  }
  func.func @transform_4(%arg0: i32, %arg1: i32) -> (i32, i32) {
    %c0_i32 = arith.constant 0 : i32
    %c0_i32_0 = arith.constant 0 : i32
    %c0_i32_1 = arith.constant 0 : i32
    return %c0_i32, %c0_i32_0 : i32, i32
  }
  func.func @transform_5(%arg0: i32, %arg1: i32) -> (i32, i32) {
    %c0_i32 = arith.constant 0 : i32
    %c0_i32_0 = arith.constant 0 : i32
    %c0_i32_1 = arith.constant 0 : i32
    return %c0_i32, %c0_i32_0 : i32, i32
  }
  func.func @transform_6(%arg0: i32, %arg1: i32) -> (i32, i32) {
    %c0_i32 = arith.constant 0 : i32
    %c0_i32_0 = arith.constant 0 : i32
    %c0_i32_1 = arith.constant 0 : i32
    return %c0_i32, %c0_i32_0 : i32, i32
  }
  func.func @transform_7(%arg0: i32, %arg1: i32) -> (i32, i32) {
    %c0_i32 = arith.constant 0 : i32
    %c0_i32_0 = arith.constant 0 : i32
    %c0_i32_1 = arith.constant 0 : i32
    return %c0_i32, %c0_i32_0 : i32, i32
  }
  func.func @transform_8(%arg0: i32, %arg1: i32) -> (i32, i32) {
    %c0_i32 = arith.constant 0 : i32
    %c0_i32_0 = arith.constant 0 : i32
    %c0_i32_1 = arith.constant 0 : i32
    return %c0_i32, %c0_i32_0 : i32, i32
  }
  func.func @transform_9(%arg0: i32, %arg1: i32) -> (i32, i32) {
    %c0_i32 = arith.constant 0 : i32
    %c0_i32_0 = arith.constant 0 : i32
    %c0_i32_1 = arith.constant 0 : i32
    return %c0_i32, %c0_i32_0 : i32, i32
  }
  func.func @transform_10(%arg0: i32, %arg1: i32) -> (i32, i32) {
    %c0_i32 = arith.constant 0 : i32
    %c0_i32_0 = arith.constant 0 : i32
    %c0_i32_1 = arith.constant 0 : i32
    return %c0_i32, %c0_i32_0 : i32, i32
  }
  func.func @transform_11(%arg0: i32, %arg1: i32) -> (i32, i32) {
    %c0_i32 = arith.constant 0 : i32
    %c0_i32_0 = arith.constant 0 : i32
    %c0_i32_1 = arith.constant 0 : i32
    return %c0_i32, %c0_i32_0 : i32, i32
  }
  func.func @transform_12(%arg0: i32, %arg1: i32) -> (i32, i32) {
    %c0_i32 = arith.constant 0 : i32
    %c0_i32_0 = arith.constant 0 : i32
    %c0_i32_1 = arith.constant 0 : i32
    return %c0_i32, %c0_i32_0 : i32, i32
  }
  func.func @transform_13(%arg0: i32, %arg1: i32) -> (i32, i32) {
    %c0_i32 = arith.constant 0 : i32
    %c0_i32_0 = arith.constant 0 : i32
    return %arg0, %c0_i32 : i32, i32
  }
}

module attributes {stable_mosaic.version = 11 : i64} {
  func.func @_enhanced_server_kernel(%arg0: i32, %arg1: i32, %arg2: memref<2x4x256xf32, #tpu.memory_space<vmem>>, %arg3: memref<4x128xf32, #tpu.memory_space<vmem>>, %arg4: memref<1x128xf32, #tpu.memory_space<vmem>>, %arg5: memref<128x128xf32, #tpu.memory_space<vmem>>, %arg6: memref<1x128xf32, #tpu.memory_space<vmem>>, %arg7: memref<1x128xf32, #tpu.memory_space<vmem>>, %arg8: memref<1x128xf32, #tpu.memory_space<vmem>>, %arg9: memref<128x128xf32, #tpu.memory_space<vmem>>, %arg10: memref<1x128xf32, #tpu.memory_space<vmem>>, %arg11: memref<1x128xf32, #tpu.memory_space<vmem>>, %arg12: memref<1x128xf32, #tpu.memory_space<vmem>>, %arg13: memref<128x128xf32, #tpu.memory_space<vmem>>, %arg14: memref<1x128xf32, #tpu.memory_space<vmem>>, %arg15: memref<2x128xf32, #tpu.memory_space<vmem>>, %arg16: memref<2x4x128xf32, #tpu.memory_space<vmem>>) attributes {dimension_semantics = [#tpu.dimension_semantics<parallel>, #tpu.dimension_semantics<arbitrary>], iteration_bounds = array<i64: 1, 1>, scalar_prefetch = 0 : i64, scratch_operands = 1 : i64, tpu.core_type = #tpu.core_type<tc>, window_params = [{transform_indices = @transform_0, window_bounds = array<i64: 2, 4, 256>}, {pipeline_mode = #tpu.pipeline_mode<synchronous>, transform_indices = @transform_1, window_bounds = array<i64: 4, 128>}, {pipeline_mode = #tpu.pipeline_mode<synchronous>, transform_indices = @transform_2, window_bounds = array<i64: 1, 128>}, {pipeline_mode = #tpu.pipeline_mode<synchronous>, transform_indices = @transform_3, window_bounds = array<i64: 128, 128>}, {pipeline_mode = #tpu.pipeline_mode<synchronous>, transform_indices = @transform_4, window_bounds = array<i64: 1, 128>}, {pipeline_mode = #tpu.pipeline_mode<synchronous>, transform_indices = @transform_5, window_bounds = array<i64: 1, 128>}, {pipeline_mode = #tpu.pipeline_mode<synchronous>, transform_indices = @transform_6, window_bounds = array<i64: 1, 128>}, {pipeline_mode = #tpu.pipeline_mode<synchronous>, transform_indices = @transform_7, window_bounds = array<i64: 128, 128>}, {pipeline_mode = #tpu.pipeline_mode<synchronous>, transform_indices = @transform_8, window_bounds = array<i64: 1, 128>}, {pipeline_mode = #tpu.pipeline_mode<synchronous>, transform_indices = @transform_9, window_bounds = array<i64: 1, 128>}, {pipeline_mode = #tpu.pipeline_mode<synchronous>, transform_indices = @transform_10, window_bounds = array<i64: 1, 128>}, {pipeline_mode = #tpu.pipeline_mode<synchronous>, transform_indices = @transform_11, window_bounds = array<i64: 128, 128>}, {pipeline_mode = #tpu.pipeline_mode<synchronous>, transform_indices = @transform_12, window_bounds = array<i64: 1, 128>}, {transform_indices = @transform_13, window_bounds = array<i64: 2, 128>}]} {
    %c0_i32 = arith.constant 0 : i32
    %0 = arith.cmpi eq, %arg1, %c0_i32 : i32
    %1 = arith.extui %0 : i1 to i32
    %c0_i32_0 = arith.constant 0 : i32
    %2 = arith.cmpi ne, %1, %c0_i32_0 : i32
    scf.if %2 {
      %cst = arith.constant 0.000000e+00 : f32
      %14 = vector.broadcast %cst : f32 to vector<2x4x128xf32>
      %c0_19 = arith.constant 0 : index
      %c0_20 = arith.constant 0 : index
      %c0_21 = arith.constant 0 : index
      %15 = vector.load %arg16[%c0_19, %c0_20, %c0_21] : memref<2x4x128xf32, #tpu.memory_space<vmem>>, vector<2x4x128xf32>
      tpu.vector_store %arg16[%c0_19, %c0_20, %c0_21], %14 {strides = array<i32>} : memref<2x4x128xf32, #tpu.memory_space<vmem>>, vector<2x4x128xf32>,
    } else {
    }
    %c0 = arith.constant 0 : index
    %c0_1 = arith.constant 0 : index
    %c0_2 = arith.constant 0 : index
    %3 = vector.load %arg2[%c0, %c0_1, %c0_2] : memref<2x4x256xf32, #tpu.memory_space<vmem>>, vector<2x4x128xf32>
    %c0_3 = arith.constant 0 : index
    %c0_4 = arith.constant 0 : index
    %c0_5 = arith.constant 0 : index
    %4 = vector.load %arg16[%c0_3, %c0_4, %c0_5] : memref<2x4x128xf32, #tpu.memory_space<vmem>>, vector<2x4x128xf32>
    %5 = arith.addf %4, %3 : vector<2x4x128xf32>
    %c0_6 = arith.constant 0 : index
    %c0_7 = arith.constant 0 : index
    %c0_8 = arith.constant 0 : index
    %6 = vector.load %arg16[%c0_6, %c0_7, %c0_8] : memref<2x4x128xf32, #tpu.memory_space<vmem>>, vector<2x4x128xf32>
    tpu.vector_store %arg16[%c0_6, %c0_7, %c0_8], %5 {strides = array<i32>} : memref<2x4x128xf32, #tpu.memory_space<vmem>>, vector<2x4x128xf32>,
    %c0_9 = arith.constant 0 : index
    %c0_10 = arith.constant 0 : index
    %c128 = arith.constant 128 : index
    %7 = vector.load %arg2[%c0_9, %c0_10, %c128] : memref<2x4x256xf32, #tpu.memory_space<vmem>>, vector<2x4x128xf32>
    %c0_11 = arith.constant 0 : index
    %c0_12 = arith.constant 0 : index
    %c0_13 = arith.constant 0 : index
    %8 = vector.load %arg16[%c0_11, %c0_12, %c0_13] : memref<2x4x128xf32, #tpu.memory_space<vmem>>, vector<2x4x128xf32>
    %9 = arith.addf %8, %7 : vector<2x4x128xf32>
    %c0_14 = arith.constant 0 : index
    %c0_15 = arith.constant 0 : index
    %c0_16 = arith.constant 0 : index
    %10 = vector.load %arg16[%c0_14, %c0_15, %c0_16] : memref<2x4x128xf32, #tpu.memory_space<vmem>>, vector<2x4x128xf32>
    tpu.vector_store %arg16[%c0_14, %c0_15, %c0_16], %9 {strides = array<i32>} : memref<2x4x128xf32, #tpu.memory_space<vmem>>, vector<2x4x128xf32>,
    %c0_i32_17 = arith.constant 0 : i32
    %11 = arith.cmpi eq, %arg1, %c0_i32_17 : i32
    %12 = arith.extui %11 : i1 to i32
    %c0_i32_18 = arith.constant 0 : i32
    %13 = arith.cmpi ne, %12, %c0_i32_18 : i32
    scf.if %13 {
      %c0_19 = arith.constant 0 : index
      %c0_20 = arith.constant 0 : index
      %c0_21 = arith.constant 0 : index
      %14 = vector.load %arg16[%c0_19, %c0_20, %c0_21] : memref<2x4x128xf32, #tpu.memory_space<vmem>>, vector<2x4x128xf32>
      %cst = arith.constant dense<0.000000e+00> : vector<2x4xf32>
      %15 = vector.multi_reduction <add>, %14, %cst [2] : vector<2x4x128xf32> to vector<2x4xf32>
      %c0_22 = arith.constant 0 : index
      %c0_23 = arith.constant 0 : index
      %16 = vector.load %arg3[%c0_22, %c0_23] : memref<4x128xf32, #tpu.memory_space<vmem>>, vector<4x128xf32>
      %cst_24 = arith.constant dense<0.000000e+00> : vector<2x128xf32>
      %17 = tpu.matmul %15, %16, %cst_24 {dimension_numbers = #tpu.dot_dimension_numbers<[1], [0], [0], [1], [0, 0, 1, 1], [], []>} : vector<2x4xf32>, vector<4x128xf32>, vector<2x128xf32> -> vector<2x128xf32>
      %c0_25 = arith.constant 0 : index
      %c0_26 = arith.constant 0 : index
      %18 = vector.load %arg4[%c0_25, %c0_26] : memref<1x128xf32, #tpu.memory_space<vmem>>, vector<1x128xf32>
      %19 = vector.broadcast %18 : vector<1x128xf32> to vector<2x128xf32>
      %20 = arith.addf %17, %19 : vector<2x128xf32>
      %cst_27 = arith.constant 0.000000e+00 : f32
      %21 = vector.broadcast %cst_27 : f32 to vector<2x128xf32>
      %22 = arith.cmpf ogt, %20, %21 : vector<2x128xf32>
      %cst_28 = arith.constant 1.000000e-01 : f32
      %23 = vector.broadcast %cst_28 : f32 to vector<2x128xf32>
      %24 = arith.mulf %23, %20 : vector<2x128xf32>
      %25 = arith.select %22, %20, %24 : vector<2x128xi1>, vector<2x128xf32>
      %c0_29 = arith.constant 0 : index
      %c0_30 = arith.constant 0 : index
      %26 = vector.load %arg5[%c0_29, %c0_30] : memref<128x128xf32, #tpu.memory_space<vmem>>, vector<128x128xf32>
      %cst_31 = arith.constant dense<0.000000e+00> : vector<2x128xf32>
      %27 = tpu.matmul %25, %26, %cst_31 {dimension_numbers = #tpu.dot_dimension_numbers<[1], [0], [0], [1], [0, 0, 1, 1], [], []>} : vector<2x128xf32>, vector<128x128xf32>, vector<2x128xf32> -> vector<2x128xf32>
      %c0_32 = arith.constant 0 : index
      %c0_33 = arith.constant 0 : index
      %28 = vector.load %arg6[%c0_32, %c0_33] : memref<1x128xf32, #tpu.memory_space<vmem>>, vector<1x128xf32>
      %29 = vector.broadcast %28 : vector<1x128xf32> to vector<2x128xf32>
      %30 = arith.addf %27, %29 : vector<2x128xf32>
      %cst_34 = arith.constant dense<0.000000e+00> : vector<2xf32>
      %31 = vector.multi_reduction <add>, %30, %cst_34 [1] : vector<2x128xf32> to vector<2xf32>
      %32 = vector.shape_cast %31 : vector<2xf32> to vector<2x1xf32>
      %cst_35 = arith.constant 3.125000e-02 : f32
      %33 = vector.broadcast %cst_35 : f32 to vector<2x1xf32>
      %34 = arith.mulf %32, %33 : vector<2x1xf32>
      %35 = vector.broadcast %34 : vector<2x1xf32> to vector<2x128xf32>
      %36 = arith.subf %30, %35 : vector<2x128xf32>
      %37 = tpu.iota {dimensions = array<i32: 1>} : vector<1x128xi32>
      %c32_i32 = arith.constant 32 : i32
      %38 = vector.broadcast %c32_i32 : i32 to vector<1x128xi32>
      %39 = arith.cmpi slt, %37, %38 : vector<1x128xi32>
      %cst_36 = arith.constant 0.000000e+00 : f32
      %40 = vector.shape_cast %39 : vector<1x128xi1> to vector<1x128xi1>
      %41 = vector.broadcast %40 : vector<1x128xi1> to vector<2x128xi1>
      %42 = vector.broadcast %cst_36 : f32 to vector<2x128xf32>
      %43 = arith.select %41, %36, %42 : vector<2x128xi1>, vector<2x128xf32>
      %44 = arith.mulf %43, %43 : vector<2x128xf32>
      %cst_37 = arith.constant dense<0.000000e+00> : vector<2xf32>
      %45 = vector.multi_reduction <add>, %44, %cst_37 [1] : vector<2x128xf32> to vector<2xf32>
      %46 = vector.shape_cast %45 : vector<2xf32> to vector<2x1xf32>
      %cst_38 = arith.constant 3.125000e-02 : f32
      %47 = vector.broadcast %cst_38 : f32 to vector<2x1xf32>
      %48 = arith.mulf %46, %47 : vector<2x1xf32>
      %cst_39 = arith.constant 9.99999974E-6 : f32
      %49 = vector.broadcast %cst_39 : f32 to vector<2x1xf32>
      %50 = arith.addf %48, %49 : vector<2x1xf32>
      %51 = math.rsqrt %50 : vector<2x1xf32>
      %52 = vector.broadcast %51 : vector<2x1xf32> to vector<2x128xf32>
      %53 = arith.mulf %43, %52 : vector<2x128xf32>
      %c0_40 = arith.constant 0 : index
      %c0_41 = arith.constant 0 : index
      %54 = vector.load %arg7[%c0_40, %c0_41] : memref<1x128xf32, #tpu.memory_space<vmem>>, vector<1x128xf32>
      %55 = vector.broadcast %54 : vector<1x128xf32> to vector<2x128xf32>
      %56 = arith.mulf %53, %55 : vector<2x128xf32>
      %c0_42 = arith.constant 0 : index
      %c0_43 = arith.constant 0 : index
      %57 = vector.load %arg8[%c0_42, %c0_43] : memref<1x128xf32, #tpu.memory_space<vmem>>, vector<1x128xf32>
      %58 = vector.broadcast %57 : vector<1x128xf32> to vector<2x128xf32>
      %59 = arith.addf %56, %58 : vector<2x128xf32>
      %cst_44 = arith.constant 0.000000e+00 : f32
      %60 = vector.broadcast %cst_44 : f32 to vector<2x128xf32>
      %61 = arith.maximumf %59, %60 : vector<2x128xf32>
      %c0_45 = arith.constant 0 : index
      %c0_46 = arith.constant 0 : index
      %62 = vector.load %arg9[%c0_45, %c0_46] : memref<128x128xf32, #tpu.memory_space<vmem>>, vector<128x128xf32>
      %cst_47 = arith.constant dense<0.000000e+00> : vector<2x128xf32>
      %63 = tpu.matmul %61, %62, %cst_47 {dimension_numbers = #tpu.dot_dimension_numbers<[1], [0], [0], [1], [0, 0, 1, 1], [], []>} : vector<2x128xf32>, vector<128x128xf32>, vector<2x128xf32> -> vector<2x128xf32>
      %c0_48 = arith.constant 0 : index
      %c0_49 = arith.constant 0 : index
      %64 = vector.load %arg10[%c0_48, %c0_49] : memref<1x128xf32, #tpu.memory_space<vmem>>, vector<1x128xf32>
      %65 = vector.broadcast %64 : vector<1x128xf32> to vector<2x128xf32>
      %66 = arith.addf %63, %65 : vector<2x128xf32>
      %cst_50 = arith.constant dense<0.000000e+00> : vector<2xf32>
      %67 = vector.multi_reduction <add>, %66, %cst_50 [1] : vector<2x128xf32> to vector<2xf32>
      %68 = vector.shape_cast %67 : vector<2xf32> to vector<2x1xf32>
      %cst_51 = arith.constant 6.250000e-02 : f32
      %69 = vector.broadcast %cst_51 : f32 to vector<2x1xf32>
      %70 = arith.mulf %68, %69 : vector<2x1xf32>
      %71 = vector.broadcast %70 : vector<2x1xf32> to vector<2x128xf32>
      %72 = arith.subf %66, %71 : vector<2x128xf32>
      %73 = tpu.iota {dimensions = array<i32: 1>} : vector<1x128xi32>
      %c16_i32 = arith.constant 16 : i32
      %74 = vector.broadcast %c16_i32 : i32 to vector<1x128xi32>
      %75 = arith.cmpi slt, %73, %74 : vector<1x128xi32>
      %cst_52 = arith.constant 0.000000e+00 : f32
      %76 = vector.shape_cast %75 : vector<1x128xi1> to vector<1x128xi1>
      %77 = vector.broadcast %76 : vector<1x128xi1> to vector<2x128xi1>
      %78 = vector.broadcast %cst_52 : f32 to vector<2x128xf32>
      %79 = arith.select %77, %72, %78 : vector<2x128xi1>, vector<2x128xf32>
      %80 = arith.mulf %79, %79 : vector<2x128xf32>
      %cst_53 = arith.constant dense<0.000000e+00> : vector<2xf32>
      %81 = vector.multi_reduction <add>, %80, %cst_53 [1] : vector<2x128xf32> to vector<2xf32>
      %82 = vector.shape_cast %81 : vector<2xf32> to vector<2x1xf32>
      %cst_54 = arith.constant 6.250000e-02 : f32
      %83 = vector.broadcast %cst_54 : f32 to vector<2x1xf32>
      %84 = arith.mulf %82, %83 : vector<2x1xf32>
      %cst_55 = arith.constant 9.99999974E-6 : f32
      %85 = vector.broadcast %cst_55 : f32 to vector<2x1xf32>
      %86 = arith.addf %84, %85 : vector<2x1xf32>
      %87 = math.rsqrt %86 : vector<2x1xf32>
      %88 = vector.broadcast %87 : vector<2x1xf32> to vector<2x128xf32>
      %89 = arith.mulf %79, %88 : vector<2x128xf32>
      %c0_56 = arith.constant 0 : index
      %c0_57 = arith.constant 0 : index
      %90 = vector.load %arg11[%c0_56, %c0_57] : memref<1x128xf32, #tpu.memory_space<vmem>>, vector<1x128xf32>
      %91 = vector.broadcast %90 : vector<1x128xf32> to vector<2x128xf32>
      %92 = arith.mulf %89, %91 : vector<2x128xf32>
      %c0_58 = arith.constant 0 : index
      %c0_59 = arith.constant 0 : index
      %93 = vector.load %arg12[%c0_58, %c0_59] : memref<1x128xf32, #tpu.memory_space<vmem>>, vector<1x128xf32>
      %94 = vector.broadcast %93 : vector<1x128xf32> to vector<2x128xf32>
      %95 = arith.addf %92, %94 : vector<2x128xf32>
      %cst_60 = arith.constant 0.000000e+00 : f32
      %96 = vector.broadcast %cst_60 : f32 to vector<2x128xf32>
      %97 = arith.maximumf %95, %96 : vector<2x128xf32>
      %c0_61 = arith.constant 0 : index
      %c0_62 = arith.constant 0 : index
      %98 = vector.load %arg13[%c0_61, %c0_62] : memref<128x128xf32, #tpu.memory_space<vmem>>, vector<128x128xf32>
      %cst_63 = arith.constant dense<0.000000e+00> : vector<2x128xf32>
      %99 = tpu.matmul %97, %98, %cst_63 {dimension_numbers = #tpu.dot_dimension_numbers<[1], [0], [0], [1], [0, 0, 1, 1], [], []>} : vector<2x128xf32>, vector<128x128xf32>, vector<2x128xf32> -> vector<2x128xf32>
      %c0_64 = arith.constant 0 : index
      %c0_65 = arith.constant 0 : index
      %100 = vector.load %arg14[%c0_64, %c0_65] : memref<1x128xf32, #tpu.memory_space<vmem>>, vector<1x128xf32>
      %101 = vector.broadcast %100 : vector<1x128xf32> to vector<2x128xf32>
      %102 = arith.addf %99, %101 : vector<2x128xf32>
      %c0_66 = arith.constant 0 : index
      %c0_67 = arith.constant 0 : index
      %103 = vector.load %arg15[%c0_66, %c0_67] : memref<2x128xf32, #tpu.memory_space<vmem>>, vector<2x128xf32>
      tpu.vector_store %arg15[%c0_66, %c0_67], %102 {strides = array<i32>} : memref<2x128xf32, #tpu.memory_space<vmem>>, vector<2x128xf32>,
    } else {
    }
    return
  }
  func.func @transform_0(%arg0: i32, %arg1: i32) -> (i32, i32, i32) {
    %c0_i32 = arith.constant 0 : i32
    %c0_i32_0 = arith.constant 0 : i32
    return %arg0, %c0_i32, %arg1 : i32, i32, i32
  }
  func.func @transform_1(%arg0: i32, %arg1: i32) -> (i32, i32) {
    %c0_i32 = arith.constant 0 : i32
    %c0_i32_0 = arith.constant 0 : i32
    %c0_i32_1 = arith.constant 0 : i32
    return %c0_i32, %c0_i32_0 : i32, i32
  }
  func.func @transform_2(%arg0: i32, %arg1: i32) -> (i32, i32) {
    %c0_i32 = arith.constant 0 : i32
    %c0_i32_0 = arith.constant 0 : i32
    %c0_i32_1 = arith.constant 0 : i32
    return %c0_i32, %c0_i32_0 : i32, i32
  }
  func.func @transform_3(%arg0: i32, %arg1: i32) -> (i32, i32) {
    %c0_i32 = arith.constant 0 : i32
    %c0_i32_0 = arith.constant 0 : i32
    %c0_i32_1 = arith.constant 0 : i32
    return %c0_i32, %c0_i32_0 : i32, i32
  }
  func.func @transform_4(%arg0: i32, %arg1: i32) -> (i32, i32) {
    %c0_i32 = arith.constant 0 : i32
    %c0_i32_0 = arith.constant 0 : i32
    %c0_i32_1 = arith.constant 0 : i32
    return %c0_i32, %c0_i32_0 : i32, i32
  }
  func.func @transform_5(%arg0: i32, %arg1: i32) -> (i32, i32) {
    %c0_i32 = arith.constant 0 : i32
    %c0_i32_0 = arith.constant 0 : i32
    %c0_i32_1 = arith.constant 0 : i32
    return %c0_i32, %c0_i32_0 : i32, i32
  }
  func.func @transform_6(%arg0: i32, %arg1: i32) -> (i32, i32) {
    %c0_i32 = arith.constant 0 : i32
    %c0_i32_0 = arith.constant 0 : i32
    %c0_i32_1 = arith.constant 0 : i32
    return %c0_i32, %c0_i32_0 : i32, i32
  }
  func.func @transform_7(%arg0: i32, %arg1: i32) -> (i32, i32) {
    %c0_i32 = arith.constant 0 : i32
    %c0_i32_0 = arith.constant 0 : i32
    %c0_i32_1 = arith.constant 0 : i32
    return %c0_i32, %c0_i32_0 : i32, i32
  }
  func.func @transform_8(%arg0: i32, %arg1: i32) -> (i32, i32) {
    %c0_i32 = arith.constant 0 : i32
    %c0_i32_0 = arith.constant 0 : i32
    %c0_i32_1 = arith.constant 0 : i32
    return %c0_i32, %c0_i32_0 : i32, i32
  }
  func.func @transform_9(%arg0: i32, %arg1: i32) -> (i32, i32) {
    %c0_i32 = arith.constant 0 : i32
    %c0_i32_0 = arith.constant 0 : i32
    %c0_i32_1 = arith.constant 0 : i32
    return %c0_i32, %c0_i32_0 : i32, i32
  }
  func.func @transform_10(%arg0: i32, %arg1: i32) -> (i32, i32) {
    %c0_i32 = arith.constant 0 : i32
    %c0_i32_0 = arith.constant 0 : i32
    %c0_i32_1 = arith.constant 0 : i32
    return %c0_i32, %c0_i32_0 : i32, i32
  }
  func.func @transform_11(%arg0: i32, %arg1: i32) -> (i32, i32) {
    %c0_i32 = arith.constant 0 : i32
    %c0_i32_0 = arith.constant 0 : i32
    %c0_i32_1 = arith.constant 0 : i32
    return %c0_i32, %c0_i32_0 : i32, i32
  }
  func.func @transform_12(%arg0: i32, %arg1: i32) -> (i32, i32) {
    %c0_i32 = arith.constant 0 : i32
    %c0_i32_0 = arith.constant 0 : i32
    %c0_i32_1 = arith.constant 0 : i32
    return %c0_i32, %c0_i32_0 : i32, i32
  }
  func.func @transform_13(%arg0: i32, %arg1: i32) -> (i32, i32) {
    %c0_i32 = arith.constant 0 : i32
    %c0_i32_0 = arith.constant 0 : i32
    return %arg0, %c0_i32 : i32, i32
  }
}

</mosaic_0001>

<bundles_post_ra>
// kernel: _forward.1
= control target key start
LH: loop header
LB: loop body
LE: loop exit
PB: predicated region body
PF: predicated region fallthrough
CT: control target
= control target key end

     0   :  { %18 = vsyncpa [#allocation4], 0  ;;  %s647_s0 = inlined_call_operand.vmem [shape: f32[2,4,256], index: 0, kind: input, shape index: {}]   ;;  %s648_s1 = inlined_call_operand.vmem [shape: f32[4,128], index: 1, kind: input, shape index: {}]   ;;  %s649_s2 = inlined_call_operand.vmem [shape: f32[1,128], index: 2, kind: input, shape index: {}]   ;;  %s650_s3 = inlined_call_operand.vmem [shape: f32[128,128], index: 3, kind: input, shape index: {}]   ;;  %s651_s4 = inlined_call_operand.vmem [shape: f32[1,128], index: 4, kind: input, shape index: {}]   ;;  %s652_s5 = inlined_call_operand.vmem [shape: f32[1,128], index: 5, kind: input, shape index: {}]   ;;  %s653_s6 = inlined_call_operand.vmem [shape: f32[1,128], index: 6, kind: input, shape index: {}]   ;;  %s654_s7 = inlined_call_operand.hbm [shape: f32[128,128], index: 7, kind: input, shape index: {}]   ;;  %s655_s8 = inlined_call_operand.vmem [shape: f32[1,128], index: 8, kind: input, shape index: {}]   ;;  %s656_s9 = inlined_call_operand.vmem [shape: f32[1,128], index: 9, kind: input, shape index: {}]   ;;  %s657_s10 = inlined_call_operand.vmem [shape: f32[1,128], index: 10, kind: input, shape index: {}]   ;;  %s658_s11 = inlined_call_operand.hbm [shape: f32[128,128], index: 11, kind: input, shape index: {}]   ;;  %s659_s12 = inlined_call_operand.vmem [shape: f32[1,128], index: 12, kind: input, shape index: {}]   ;;  %s660_s13 = inlined_call_operand.hbm [shape: f32[2,128], index: 13, kind: output, shape index: {}]  }
   0x1   :  { %19 = vsyncpa [#allocation7], 0 }
   0x2   :  { %20 = vsyncpa [#allocation5], 0  ;;  %s39_s27 = sshll.u32 %s654_s7, 4  ;;  %s465_s28 = smov [#allocation3]   ;;  %s40_s27 = int_to_ptr.hbm [resolvable:$true] %s39_s27 }
   0x3   :  { %s41_s29 = sshll.u32 %s465_s28, 4  ;;  %s58_s15 = sshll.u32 %s658_s11, 4  ;;  %s42_s29 = int_to_ptr.vmem [resolvable:$true] %s41_s29  ;;  %s59_s15 = int_to_ptr.hbm [resolvable:$true] %s58_s15 }
   0x4   :  { %s466_s16 = smov 128   ;;  %s467_s17 = smov 8  }
   0x5   :  { %47 = dma.hbm_to_vmem [thread:$0]  %s40_s27, 2048, %s42_s29, [#allocation4], %s466_s16, %s466_s16, %s467_s17  }
   0x6   :  { %s468_s18 = smov [#allocation6]  }
   0x7   :  { %s60_s19 = sshll.u32 %s468_s18, 4  ;;  %s61_s19 = int_to_ptr.vmem [resolvable:$true] %s60_s19 }
   0x8   :  { %66 = dma.hbm_to_vmem [thread:$0]  %s59_s15, 2048, %s61_s19, [#allocation7], %s466_s16, %s466_s16, %s467_s17  }
   0x9   :  { %459 = dma.done.wait [#allocation4], 2048  }
   0xa   :  { %460 = vsyncadd [#allocation4], 4294965248 }
   0xb   :  { %461 = dma.done.wait [#allocation7], 2048  }
   0xc   :  { %462 = vsyncadd [#allocation7], 4294965248  ;;  %v469_v0 = vmov 0.0   ;;  %v83_v1 = vld [vmem:[%s647_s0] sm:$0xf]  ;;  %vm104_vm0 = vcmask 1043456   ;;  %v118_v31 = vlaneseq }
   0xd   :  { %81 = vst [vmem:[#allocation2] sm:$0xf] %v469_v0  ;;  %v84_v2 = vld [vmem:[%s647_s0 + $0x8] sm:$0xf]  ;;  %v91_v7 = vld [vmem:[%s647_s0 + $0x4] sm:$0xf] }
   0xe   :  { %82 = vst [vmem:[#allocation2 + $0x4] sm:$0xf] %v469_v0  ;;  %v92_v8 = vld [vmem:[%s647_s0 + $0xc] sm:$0xf]  ;;  %v111_v17 = vld [vmem:[%s648_s1] sm:$0xf] }
   0xf   :  { %367 = vmatpush.msk.msra.mxu0 %vm104_vm0, %v111_v17  ;;  %v168_v18 = vld [vmem:[%s650_s3 + $0x78] sm:$0xff]  ;;  %v167_v19 = vld [vmem:[%s650_s3 + $0x70] sm:$0xff]  ;;  %v166_v20 = vld [vmem:[%s650_s3 + $0x68] sm:$0xff]  ;;  %v601_v33 = vand.u32 127, %v118_v31  ;;  %vm122_vm1 = vcmask 1041409   ;;  %vm124_vm2 = vcmask 31744  }
  0x10   :  { %173 = vmatpush.msra.mxu1 %v168_v18  ;;  %v165_v21 = vld [vmem:[%s650_s3 + $0x60] sm:$0xff]  ;;  %v164_v22 = vld [vmem:[%s650_s3 + $0x58] sm:$0xff]  ;;  %v163_v23 = vld [vmem:[%s650_s3 + $0x50] sm:$0xff]  ;;  %vm193_vm4 = vcmask 1041408   ;;  %s470_s28 = smov [#allocation8]  }
  0x11   :  { %v162_v24 = vld [vmem:[%s650_s3 + $0x48] sm:$0xff]  ;;  %v161_v25 = vld [vmem:[%s650_s3 + $0x40] sm:$0xff]  ;;  %v160_v26 = vld [vmem:[%s650_s3 + $0x38] sm:$0xff]  ;;  %vm199_vm5 = vcmp.lt.s32.totalorder %v601_v33, 32  ;;  %vm276_vm9 = vcmp.lt.s32.totalorder %v601_v33, 16  ;;  %s354_s0 = sshll.u32 %s470_s28, 4  ;;  %s355_s0 = int_to_ptr.vmem [resolvable:$true] %s354_s0 }
  0x12   :  { %174 = vmatpush.msra.mxu1 %v167_v19  ;;  %v159_v27 = vld [vmem:[%s650_s3 + $0x30] sm:$0xff]  ;;  %v158_v28 = vld [vmem:[%s650_s3 + $0x28] sm:$0xff]  ;;  %v157_v30 = vld [vmem:[%s650_s3 + $0x20] sm:$0xff] }
  0x13   :  { %v156_v32 = vld [vmem:[%s650_s3 + $0x18] sm:$0xff]  ;;  %v155_v38 = vld [vmem:[%s650_s3 + $0x10] sm:$0xff]  ;;  %v154_v39 = vld [vmem:[%s650_s3 + $0x8] sm:$0xff] }
  0x14   :  { %v85_v3 = vld [vmem:[#allocation2] sm:$0xf]  ;;  %175 = vmatpush.msra.mxu1 %v166_v20  ;;  %v245_v57 = vld [vmem:[#allocation3 + $0x70] sm:$0xff]  ;;  %v244_v58 = vld [vmem:[#allocation3 + $0x68] sm:$0xff] }
  0x15   :  { %v87_v4 = vadd.f32 %v85_v3, %v83_v1  ;;  %v86_v5 = vld [vmem:[#allocation2 + $0x4] sm:$0xf]  ;;  %v375_v41 = vld [vmem:[%s649_s2] ss:$0 sm:$0xff]  ;;  %v243_v59 = vld [vmem:[#allocation3 + $0x60] sm:$0xff] }
  0x16   :  { %v88_v6 = vadd.f32 %v86_v5, %v84_v2  ;;  %176 = vmatpush.msra.mxu1 %v165_v21  ;;  %v153_v40 = vld [vmem:[%s650_s3] sm:$0xff]  ;;  %v241_v61 = vld [vmem:[#allocation3 + $0x50] sm:$0xff]  ;;  %v240_v62 = vld [vmem:[#allocation3 + $0x48] sm:$0xff] }
  0x17   :  { %89 = vst [vmem:[#allocation2] sm:$0xf] %v87_v4  ;;  %v376_v46 = vld [vmem:[%s651_s4] ss:$0 sm:$0xff]  ;;  %v239_v63 = vld [vmem:[#allocation3 + $0x40] sm:$0xff]  ;;  %v237_v1 = vld [vmem:[#allocation3 + $0x30] sm:$0xff] }
  0x18   :  { %90 = vst [vmem:[#allocation2 + $0x4] sm:$0xf] %v88_v6  ;;  %177 = vmatpush.msra.mxu1 %v164_v22  ;;  %v246_v50 = vld [vmem:[#allocation3 + $0x78] sm:$0xff]  ;;  %v236_v2 = vld [vmem:[#allocation3 + $0x28] sm:$0xff]  ;;  %v235_v3 = vld [vmem:[#allocation3 + $0x20] sm:$0xff] }
  0x19   :  { %251 = vmatpush.msra.mxu2 %v246_v50  ;;  %v242_v60 = vld [vmem:[#allocation3 + $0x58] sm:$0xff]  ;;  %v233_v5 = vld [vmem:[#allocation3 + $0x10] sm:$0xff]  ;;  %v232_v6 = vld [vmem:[#allocation3 + $0x8] sm:$0xff] }
  0x1a   :  { %178 = vmatpush.msra.mxu1 %v163_v23  ;;  %v238_v0 = vld [vmem:[#allocation3 + $0x38] sm:$0xff] }
  0x1b   :  { %252 = vmatpush.msra.mxu2 %v245_v57  ;;  %v234_v4 = vld [vmem:[#allocation3 + $0x18] sm:$0xff] }
  0x1c   :  { %179 = vmatpush.msra.mxu1 %v162_v24  ;;  %v377_v17 = vld [vmem:[%s652_s5] ss:$0 sm:$0xff] }
  0x1d   :  { %253 = vmatpush.msra.mxu2 %v244_v58  ;;  %v378_v20 = vld [vmem:[%s653_s6] ss:$0 sm:$0xff] }
  0x1e   :  { %v93_v9 = vld [vmem:[#allocation2] sm:$0xf]  ;;  %180 = vmatpush.msra.mxu1 %v161_v25 }
  0x1f   :  { %v95_v10 = vadd.f32 %v93_v9, %v91_v7  ;;  %v94_v11 = vld [vmem:[#allocation2 + $0x4] sm:$0xf]  ;;  %254 = vmatpush.msra.mxu2 %v243_v59  ;;  %v231_v7 = vld [vmem:[#allocation3] sm:$0xff]  ;;  %v379_v24 = vld [vmem:[%s655_s8] ss:$0 sm:$0xff] }
  0x20   :  { %v96_v12 = vadd.f32 %v94_v11, %v92_v8  ;;  %181 = vmatpush.msra.mxu1 %v160_v26  ;;  %v380_v59 = vld [vmem:[%s656_s9] ss:$0 sm:$0xff]  ;;  %s356_s9 = sshll.u32 %s660_s13, 4  ;;  %s357_s9 = int_to_ptr.hbm [resolvable:$true] %s356_s9 }
  0x21   :  { %97 = vst [vmem:[#allocation2] sm:$0xf] %v95_v10  ;;  %255 = vmatpush.msra.mxu2 %v242_v60 }
  0x22   :  { %98 = vst [vmem:[#allocation2 + $0x4] sm:$0xf] %v96_v12  ;;  %182 = vmatpush.msra.mxu1 %v159_v27 }
  0x23   :  { %256 = vmatpush.msra.mxu2 %v241_v61 }
  0x24   :  { %183 = vmatpush.msra.mxu1 %v158_v28  ;;  %v323_v28 = vld [vmem:[#allocation6 + $0x78] sm:$0xff] }
  0x25   :  { %257 = vmatpush.msra.mxu2 %v240_v62  ;;  %328 = vmatpush.msra.mxu3 %v323_v28  ;;  %v381_v62 = vld [vmem:[%s657_s10] ss:$0 sm:$0xff] }
  0x26   :  { %184 = vmatpush.msra.mxu1 %v157_v30 }
  0x27   :  { %258 = vmatpush.msra.mxu2 %v239_v63 }
  0x28   :  { %v102_v13 = vld [vmem:[#allocation2] sm:$0xf]  ;;  %185 = vmatpush.msra.mxu1 %v156_v32 }
  0x29   :  { %v105_v14 = vsel %vm104_vm0, %v102_v13, 0.0  ;;  %v103_v15 = vld [vmem:[#allocation2 + $0x4] sm:$0xf]  ;;  %259 = vmatpush.msra.mxu2 %v238_v0 }
  0x2a   :  { %106 = vadd.xlane.f32.xlu0 %v105_v14  ;;  %v108_v16 = vsel %vm104_vm0, %v103_v15, 0.0  ;;  %186 = vmatpush.msra.mxu1 %v155_v38  ;;  %v320_v38 = vld [vmem:[#allocation6 + $0x60] sm:$0xff] }
  0x2b   :  { %260 = vmatpush.msra.mxu2 %v237_v1 }
  0x2c   :  { %187 = vmatpush.msra.mxu1 %v154_v39  ;;  %v319_v39 = vld [vmem:[#allocation6 + $0x58] sm:$0xff] }
  0x2d   :  { %261 = vmatpush.msra.mxu2 %v236_v2  ;;  %v382_v2 = vld [vmem:[%s659_s12] ss:$0 sm:$0xff] }
  0x2e   :  { %188 = vmatpush.msra.mxu1 %v153_v40  ;;  %v318_v40 = vld [vmem:[#allocation6 + $0x50] sm:$0xff] }
  0x2f   :  { %262 = vmatpush.msra.mxu2 %v235_v3 }
  0x31   :  { %263 = vmatpush.msra.mxu2 %v234_v4 }
  0x32   :  { %109 = vadd.xlane.f32.xlu0 %v108_v16 }
  0x33   :  { %264 = vmatpush.msra.mxu2 %v233_v5 }
  0x35   :  { %265 = vmatpush.msra.mxu2 %v232_v6 }
  0x37   :  { %266 = vmatpush.msra.mxu2 %v231_v7 }
  0x9d   :  { %v107_v29 = vpop.xlane.xlu0 %106 }
  0x9e   :  { %v120_v35 = vperm.slane %v107_v29, %v601_v33 }
  0xa5   :  { %v110_v34 = vpop.xlane.xlu0 %109 }
  0xa6   :  { %v121_v36 = vperm.slane %v110_v34, %v601_v33  ;;  %v315_v33 = vld [vmem:[#allocation6 + $0x38] sm:$0xff] }
  0xa8   :  { %v123_v37 = vsel %vm122_vm1, %v121_v36, %v120_v35  ;;  %v322_v36 = vld [vmem:[#allocation6 + $0x70] sm:$0xff] }
  0xa9   :  { %368 = vmatmul.msk.f32.vlgmr.msra.gmra.mxu0 %vm124_vm2, %v123_v37  ;;  %329 = vmatpush.msra.mxu3 %v322_v36  ;;  %v321_v37 = vld [vmem:[#allocation6 + $0x68] sm:$0xff] }
  0xab   :  { %330 = vmatpush.msra.mxu3 %v321_v37 }
  0xad   :  { %331 = vmatpush.msra.mxu3 %v320_v38 }
  0xaf   :  { %332 = vmatpush.msra.mxu3 %v319_v39 }
  0xb1   :  { %333 = vmatpush.msra.mxu3 %v318_v40 }
 0x126   :  { %v147_v42 = vpop.f32.mrf.mxu0 }
 0x127   :  { %v148_v43 = vadd.f32 %v375_v41, %v147_v42  ;;  %v317_v41 = vld [vmem:[#allocation6 + $0x48] sm:$0xff]  ;;  %v316_v42 = vld [vmem:[#allocation6 + $0x40] sm:$0xff] }
 0x128   :  { %334 = vmatpush.msra.mxu3 %v317_v41 }
 0x129   :  { %vm150_vm3 = vcmp.gt.f32.partialorder %v148_v43, 0.0  ;;  %v151_v44 = vmul.f32 0.1, %v148_v43 }
 0x12a   :  { %335 = vmatpush.msra.mxu3 %v316_v42 }
 0x12b   :  { %v152_v45 = vsel %vm150_vm3, %v148_v43, %v151_v44  ;;  %v314_v43 = vld [vmem:[#allocation6 + $0x30] sm:$0xff]  ;;  %v313_v44 = vld [vmem:[#allocation6 + $0x28] sm:$0xff] }
 0x12c   :  { %189 = vmatmul.f32.vlgmr.msra.gmra.mxu1 %v152_v45  ;;  %336 = vmatpush.msra.mxu3 %v315_v33  ;;  %v312_v45 = vld [vmem:[#allocation6 + $0x20] sm:$0xff] }
 0x12e   :  { %337 = vmatpush.msra.mxu3 %v314_v43 }
 0x130   :  { %338 = vmatpush.msra.mxu3 %v313_v44 }
 0x132   :  { %339 = vmatpush.msra.mxu3 %v312_v45 }
 0x1a9   :  { %v190_v47 = vpop.f32.mrf.mxu1 }
 0x1aa   :  { %v191_v48 = vadd.f32 %v376_v46, %v190_v47  ;;  %v311_v46 = vld [vmem:[#allocation6 + $0x18] sm:$0xff]  ;;  %v310_v47 = vld [vmem:[#allocation6 + $0x10] sm:$0xff] }
 0x1ab   :  { %340 = vmatpush.msra.mxu3 %v311_v46 }
 0x1ac   :  { %v194_v49 = vsel %vm193_vm4, %v191_v48, 0.0 }
 0x1ad   :  { %195 = vadd.xlane.f32.xlu1 %v194_v49  ;;  %341 = vmatpush.msra.mxu3 %v310_v47  ;;  %v308_v49 = vld [vmem:[#allocation6] sm:$0xff] }
 0x220   :  { %v196_v51 = vpop.xlane.xlu1 %195 }
 0x221   :  { %v197_v52 = vmul.f32 0.03125, %v196_v51 }
 0x223   :  { %v198_v53 = vsub.f32 %v191_v48, %v197_v52  ;;  %v309_v48 = vld [vmem:[#allocation6 + $0x8] sm:$0xff] }
 0x224   :  { %342 = vmatpush.msra.mxu3 %v309_v48 }
 0x225   :  { %v202_v54 = vsel %vm199_vm5, %v198_v53, 0.0 }
 0x226   :  { %v203_v55 = vmul.f32 %v202_v54, %v202_v54  ;;  %343 = vmatpush.msra.mxu3 %v308_v49 }
 0x228   :  { %v204_v56 = vsel %vm193_vm4, %v203_v55, 0.0 }
 0x229   :  { %205 = vadd.xlane.f32.xlu1 %v204_v56 }
 0x29c   :  { %v206_v8 = vpop.xlane.xlu1 %205 }
 0x29d   :  { %v207_v9 = vmul.f32 0.03125, %v206_v8 }
 0x29f   :  { %v208_v10 = vadd.f32 1e-05, %v207_v9 }
 0x2a1   :  { %383 = vrsqrt.f32 %v208_v10  ;;  %vm215_vm7 = vweird.f32 %v208_v10 }
 0x2a7   :  { %v384_v11 = vpop.eup %383 }
 0x2a8   :  { %v210_v12 = vmul.f32 %v384_v11, %v208_v10  ;;  %vm216_vm6 = vweird.f32 %v384_v11 }
 0x2a9   :  { %vm217_vm8 = vmor %vm215_vm7, %vm216_vm6 }
 0x2aa   :  { %v211_v13 = vmul.f32 %v384_v11, %v210_v12 }
 0x2ac   :  { %v212_v14 = vmul.f32 0.5, %v211_v13 }
 0x2ae   :  { %v213_v15 = vsub.f32 1.5, %v212_v14 }
 0x2b0   :  { %v214_v16 = vmul.f32 %v384_v11, %v213_v15 }
 0x2b2   :  { %v218_v18 = vsel %vm217_vm8, %v384_v11, %v214_v16 }
 0x2b3   :  { %v219_v19 = vmul.f32 %v218_v18, %v202_v54 }
 0x2b5   :  { %v224_v21 = vmul.f32 %v377_v17, %v219_v19 }
 0x2b7   :  { %v229_v22 = vadd.f32 %v378_v20, %v224_v21 }
 0x2b9   :  { %v230_v23 = vmax.f32 %v229_v22, 0.0 }
 0x2bb   :  { %267 = vmatmul.f32.vlgmr.msra.gmra.mxu2 %v230_v23 }
 0x33e   :  { %v268_v25 = vpop.f32.mrf.mxu2 }
 0x33f   :  { %v269_v26 = vadd.f32 %v379_v24, %v268_v25 }
 0x341   :  { %v271_v27 = vsel %vm193_vm4, %v269_v26, 0.0 }
 0x342   :  { %272 = vadd.xlane.f32.xlu2 %v271_v27 }
 0x3b5   :  { %v273_v29 = vpop.xlane.xlu2 %272 }
 0x3b6   :  { %v274_v30 = vmul.f32 0.0625, %v273_v29 }
 0x3b8   :  { %v275_v31 = vsub.f32 %v269_v26, %v274_v30 }
 0x3ba   :  { %v279_v32 = vsel %vm276_vm9, %v275_v31, 0.0 }
 0x3bb   :  { %v280_v34 = vmul.f32 %v279_v32, %v279_v32 }
 0x3bd   :  { %v281_v35 = vsel %vm193_vm4, %v280_v34, 0.0 }
 0x3be   :  { %282 = vadd.xlane.f32.xlu2 %v281_v35 }
 0x431   :  { %v283_v50 = vpop.xlane.xlu2 %282 }
 0x432   :  { %v284_v51 = vmul.f32 0.0625, %v283_v50 }
 0x434   :  { %v285_v52 = vadd.f32 1e-05, %v284_v51 }
 0x436   :  { %385 = vrsqrt.f32 %v285_v52  ;;  %vm292_vm11 = vweird.f32 %v285_v52 }
 0x43c   :  { %v386_v53 = vpop.eup %385 }
 0x43d   :  { %v287_v54 = vmul.f32 %v386_v53, %v285_v52  ;;  %vm293_vm10 = vweird.f32 %v386_v53 }
 0x43e   :  { %vm294_vm12 = vmor %vm292_vm11, %vm293_vm10 }
 0x43f   :  { %v288_v55 = vmul.f32 %v386_v53, %v287_v54 }
 0x441   :  { %v289_v56 = vmul.f32 0.5, %v288_v55 }
 0x443   :  { %v290_v57 = vsub.f32 1.5, %v289_v56 }
 0x445   :  { %v291_v58 = vmul.f32 %v386_v53, %v290_v57 }
 0x447   :  { %v295_v60 = vsel %vm294_vm12, %v386_v53, %v291_v58 }
 0x448   :  { %v296_v61 = vmul.f32 %v295_v60, %v279_v32 }
 0x44a   :  { %v301_v63 = vmul.f32 %v380_v59, %v296_v61 }
 0x44c   :  { %v306_v0 = vadd.f32 %v381_v62, %v301_v63 }
 0x44e   :  { %v307_v1 = vmax.f32 %v306_v0, 0.0 }
 0x450   :  { %344 = vmatmul.f32.vlgmr.msra.gmra.mxu3 %v307_v1 }
 0x4d3   :  { %v345_v3 = vpop.f32.mrf.mxu3 }
 0x4d4   :  { %v346_v4 = vadd.f32 %v382_v2, %v345_v3 }
 0x4d6   :  { %348 = vst [vmem:[#allocation8] sm:$0x3] %v346_v4 }
 0x4d7   :  { %359 = dma.vmem_to_hbm [thread:$0]  %s355_s0, 32, %s357_s9, [#allocation5]  }
 0x4d8   :  { %463 = dma.done.wait [#allocation5], 32  }
 0x4d9   :  { %464 = vsyncadd [#allocation5], 4294967264 }
 0x4da   :  { %364 = vsyncpa [#allocation4], 1 }
 0x4db   :  { %365 = vsyncpa [#allocation7], 1 }
 0x4dc   :  { %366 = vsyncpa [#allocation5], 1 }

// kernel: _forward.1
= control target key start
LH: loop header
LB: loop body
LE: loop exit
PB: predicated region body
PF: predicated region fallthrough
CT: control target
= control target key end

     0   :  { %18 = vsyncpa [#allocation4], 0  ;;  %s647_s0 = inlined_call_operand.vmem [shape: f32[2,4,256], index: 0, kind: input, shape index: {}]   ;;  %s648_s1 = inlined_call_operand.vmem [shape: f32[4,128], index: 1, kind: input, shape index: {}]   ;;  %s649_s2 = inlined_call_operand.vmem [shape: f32[1,128], index: 2, kind: input, shape index: {}]   ;;  %s650_s3 = inlined_call_operand.vmem [shape: f32[128,128], index: 3, kind: input, shape index: {}]   ;;  %s651_s4 = inlined_call_operand.vmem [shape: f32[1,128], index: 4, kind: input, shape index: {}]   ;;  %s652_s5 = inlined_call_operand.vmem [shape: f32[1,128], index: 5, kind: input, shape index: {}]   ;;  %s653_s6 = inlined_call_operand.vmem [shape: f32[1,128], index: 6, kind: input, shape index: {}]   ;;  %s654_s7 = inlined_call_operand.hbm [shape: f32[128,128], index: 7, kind: input, shape index: {}]   ;;  %s655_s8 = inlined_call_operand.vmem [shape: f32[1,128], index: 8, kind: input, shape index: {}]   ;;  %s656_s9 = inlined_call_operand.vmem [shape: f32[1,128], index: 9, kind: input, shape index: {}]   ;;  %s657_s10 = inlined_call_operand.vmem [shape: f32[1,128], index: 10, kind: input, shape index: {}]   ;;  %s658_s11 = inlined_call_operand.hbm [shape: f32[128,128], index: 11, kind: input, shape index: {}]   ;;  %s659_s12 = inlined_call_operand.vmem [shape: f32[1,128], index: 12, kind: input, shape index: {}]   ;;  %s660_s13 = inlined_call_operand.hbm [shape: f32[2,128], index: 13, kind: output, shape index: {}]  }
   0x1   :  { %19 = vsyncpa [#allocation7], 0 }
   0x2   :  { %20 = vsyncpa [#allocation5], 0  ;;  %s39_s27 = sshll.u32 %s654_s7, 4  ;;  %s465_s28 = smov [#allocation3]   ;;  %s40_s27 = int_to_ptr.hbm [resolvable:$true] %s39_s27 }
   0x3   :  { %s41_s29 = sshll.u32 %s465_s28, 4  ;;  %s58_s15 = sshll.u32 %s658_s11, 4  ;;  %s42_s29 = int_to_ptr.vmem [resolvable:$true] %s41_s29  ;;  %s59_s15 = int_to_ptr.hbm [resolvable:$true] %s58_s15 }
   0x4   :  { %s466_s16 = smov 128   ;;  %s467_s17 = smov 8  }
   0x5   :  { %47 = dma.hbm_to_vmem [thread:$0]  %s40_s27, 2048, %s42_s29, [#allocation4], %s466_s16, %s466_s16, %s467_s17  }
   0x6   :  { %s468_s18 = smov [#allocation6]  }
   0x7   :  { %s60_s19 = sshll.u32 %s468_s18, 4  ;;  %s61_s19 = int_to_ptr.vmem [resolvable:$true] %s60_s19 }
   0x8   :  { %66 = dma.hbm_to_vmem [thread:$0]  %s59_s15, 2048, %s61_s19, [#allocation7], %s466_s16, %s466_s16, %s467_s17  }
   0x9   :  { %459 = dma.done.wait [#allocation4], 2048  }
   0xa   :  { %460 = vsyncadd [#allocation4], 4294965248 }
   0xb   :  { %461 = dma.done.wait [#allocation7], 2048  }
   0xc   :  { %462 = vsyncadd [#allocation7], 4294965248  ;;  %v469_v0 = vmov 0.0   ;;  %v83_v1 = vld [vmem:[%s647_s0] sm:$0xf]  ;;  %vm104_vm0 = vcmask 1043456   ;;  %v118_v31 = vlaneseq }
   0xd   :  { %81 = vst [vmem:[#allocation2] sm:$0xf] %v469_v0  ;;  %v84_v2 = vld [vmem:[%s647_s0 + $0x8] sm:$0xf]  ;;  %v91_v7 = vld [vmem:[%s647_s0 + $0x4] sm:$0xf] }
   0xe   :  { %82 = vst [vmem:[#allocation2 + $0x4] sm:$0xf] %v469_v0  ;;  %v92_v8 = vld [vmem:[%s647_s0 + $0xc] sm:$0xf]  ;;  %v111_v17 = vld [vmem:[%s648_s1] sm:$0xf] }
   0xf   :  { %367 = vmatpush.msk.msra.mxu0 %vm104_vm0, %v111_v17  ;;  %v168_v18 = vld [vmem:[%s650_s3 + $0x78] sm:$0xff]  ;;  %v167_v19 = vld [vmem:[%s650_s3 + $0x70] sm:$0xff]  ;;  %v166_v20 = vld [vmem:[%s650_s3 + $0x68] sm:$0xff]  ;;  %v601_v33 = vand.u32 127, %v118_v31  ;;  %vm122_vm1 = vcmask 1041409   ;;  %vm124_vm2 = vcmask 31744  }
  0x10   :  { %173 = vmatpush.msra.mxu1 %v168_v18  ;;  %v165_v21 = vld [vmem:[%s650_s3 + $0x60] sm:$0xff]  ;;  %v164_v22 = vld [vmem:[%s650_s3 + $0x58] sm:$0xff]  ;;  %v163_v23 = vld [vmem:[%s650_s3 + $0x50] sm:$0xff]  ;;  %vm193_vm4 = vcmask 1041408   ;;  %s470_s28 = smov [#allocation8]  }
  0x11   :  { %v162_v24 = vld [vmem:[%s650_s3 + $0x48] sm:$0xff]  ;;  %v161_v25 = vld [vmem:[%s650_s3 + $0x40] sm:$0xff]  ;;  %v160_v26 = vld [vmem:[%s650_s3 + $0x38] sm:$0xff]  ;;  %vm199_vm5 = vcmp.lt.s32.totalorder %v601_v33, 32  ;;  %vm276_vm9 = vcmp.lt.s32.totalorder %v601_v33, 16  ;;  %s354_s0 = sshll.u32 %s470_s28, 4  ;;  %s355_s0 = int_to_ptr.vmem [resolvable:$true] %s354_s0 }
  0x12   :  { %174 = vmatpush.msra.mxu1 %v167_v19  ;;  %v159_v27 = vld [vmem:[%s650_s3 + $0x30] sm:$0xff]  ;;  %v158_v28 = vld [vmem:[%s650_s3 + $0x28] sm:$0xff]  ;;  %v157_v30 = vld [vmem:[%s650_s3 + $0x20] sm:$0xff] }
  0x13   :  { %v156_v32 = vld [vmem:[%s650_s3 + $0x18] sm:$0xff]  ;;  %v155_v38 = vld [vmem:[%s650_s3 + $0x10] sm:$0xff]  ;;  %v154_v39 = vld [vmem:[%s650_s3 + $0x8] sm:$0xff] }
  0x14   :  { %v85_v3 = vld [vmem:[#allocation2] sm:$0xf]  ;;  %175 = vmatpush.msra.mxu1 %v166_v20  ;;  %v245_v57 = vld [vmem:[#allocation3 + $0x70] sm:$0xff]  ;;  %v244_v58 = vld [vmem:[#allocation3 + $0x68] sm:$0xff] }
  0x15   :  { %v87_v4 = vadd.f32 %v85_v3, %v83_v1  ;;  %v86_v5 = vld [vmem:[#allocation2 + $0x4] sm:$0xf]  ;;  %v375_v41 = vld [vmem:[%s649_s2] ss:$0 sm:$0xff]  ;;  %v243_v59 = vld [vmem:[#allocation3 + $0x60] sm:$0xff] }
  0x16   :  { %v88_v6 = vadd.f32 %v86_v5, %v84_v2  ;;  %176 = vmatpush.msra.mxu1 %v165_v21  ;;  %v153_v40 = vld [vmem:[%s650_s3] sm:$0xff]  ;;  %v241_v61 = vld [vmem:[#allocation3 + $0x50] sm:$0xff]  ;;  %v240_v62 = vld [vmem:[#allocation3 + $0x48] sm:$0xff] }
  0x17   :  { %89 = vst [vmem:[#allocation2] sm:$0xf] %v87_v4  ;;  %v376_v46 = vld [vmem:[%s651_s4] ss:$0 sm:$0xff]  ;;  %v239_v63 = vld [vmem:[#allocation3 + $0x40] sm:$0xff]  ;;  %v237_v1 = vld [vmem:[#allocation3 + $0x30] sm:$0xff] }
  0x18   :  { %90 = vst [vmem:[#allocation2 + $0x4] sm:$0xf] %v88_v6  ;;  %177 = vmatpush.msra.mxu1 %v164_v22  ;;  %v246_v50 = vld [vmem:[#allocation3 + $0x78] sm:$0xff]  ;;  %v236_v2 = vld [vmem:[#allocation3 + $0x28] sm:$0xff]  ;;  %v235_v3 = vld [vmem:[#allocation3 + $0x20] sm:$0xff] }
  0x19   :  { %251 = vmatpush.msra.mxu2 %v246_v50  ;;  %v242_v60 = vld [vmem:[#allocation3 + $0x58] sm:$0xff]  ;;  %v233_v5 = vld [vmem:[#allocation3 + $0x10] sm:$0xff]  ;;  %v232_v6 = vld [vmem:[#allocation3 + $0x8] sm:$0xff] }
  0x1a   :  { %178 = vmatpush.msra.mxu1 %v163_v23  ;;  %v238_v0 = vld [vmem:[#allocation3 + $0x38] sm:$0xff] }
  0x1b   :  { %252 = vmatpush.msra.mxu2 %v245_v57  ;;  %v234_v4 = vld [vmem:[#allocation3 + $0x18] sm:$0xff] }
  0x1c   :  { %179 = vmatpush.msra.mxu1 %v162_v24  ;;  %v377_v17 = vld [vmem:[%s652_s5] ss:$0 sm:$0xff] }
  0x1d   :  { %253 = vmatpush.msra.mxu2 %v244_v58  ;;  %v378_v20 = vld [vmem:[%s653_s6] ss:$0 sm:$0xff] }
  0x1e   :  { %v93_v9 = vld [vmem:[#allocation2] sm:$0xf]  ;;  %180 = vmatpush.msra.mxu1 %v161_v25 }
  0x1f   :  { %v95_v10 = vadd.f32 %v93_v9, %v91_v7  ;;  %v94_v11 = vld [vmem:[#allocation2 + $0x4] sm:$0xf]  ;;  %254 = vmatpush.msra.mxu2 %v243_v59  ;;  %v231_v7 = vld [vmem:[#allocation3] sm:$0xff]  ;;  %v379_v24 = vld [vmem:[%s655_s8] ss:$0 sm:$0xff] }
  0x20   :  { %v96_v12 = vadd.f32 %v94_v11, %v92_v8  ;;  %181 = vmatpush.msra.mxu1 %v160_v26  ;;  %v380_v59 = vld [vmem:[%s656_s9] ss:$0 sm:$0xff]  ;;  %s356_s9 = sshll.u32 %s660_s13, 4  ;;  %s357_s9 = int_to_ptr.hbm [resolvable:$true] %s356_s9 }
  0x21   :  { %97 = vst [vmem:[#allocation2] sm:$0xf] %v95_v10  ;;  %255 = vmatpush.msra.mxu2 %v242_v60 }
  0x22   :  { %98 = vst [vmem:[#allocation2 + $0x4] sm:$0xf] %v96_v12  ;;  %182 = vmatpush.msra.mxu1 %v159_v27 }
  0x23   :  { %256 = vmatpush.msra.mxu2 %v241_v61 }
  0x24   :  { %183 = vmatpush.msra.mxu1 %v158_v28  ;;  %v323_v28 = vld [vmem:[#allocation6 + $0x78] sm:$0xff] }
  0x25   :  { %257 = vmatpush.msra.mxu2 %v240_v62  ;;  %328 = vmatpush.msra.mxu3 %v323_v28  ;;  %v381_v62 = vld [vmem:[%s657_s10] ss:$0 sm:$0xff] }
  0x26   :  { %184 = vmatpush.msra.mxu1 %v157_v30 }
  0x27   :  { %258 = vmatpush.msra.mxu2 %v239_v63 }
  0x28   :  { %v102_v13 = vld [vmem:[#allocation2] sm:$0xf]  ;;  %185 = vmatpush.msra.mxu1 %v156_v32 }
  0x29   :  { %v105_v14 = vsel %vm104_vm0, %v102_v13, 0.0  ;;  %v103_v15 = vld [vmem:[#allocation2 + $0x4] sm:$0xf]  ;;  %259 = vmatpush.msra.mxu2 %v238_v0 }
  0x2a   :  { %106 = vadd.xlane.f32.xlu0 %v105_v14  ;;  %v108_v16 = vsel %vm104_vm0, %v103_v15, 0.0  ;;  %186 = vmatpush.msra.mxu1 %v155_v38  ;;  %v320_v38 = vld [vmem:[#allocation6 + $0x60] sm:$0xff] }
  0x2b   :  { %260 = vmatpush.msra.mxu2 %v237_v1 }
  0x2c   :  { %187 = vmatpush.msra.mxu1 %v154_v39  ;;  %v319_v39 = vld [vmem:[#allocation6 + $0x58] sm:$0xff] }
  0x2d   :  { %261 = vmatpush.msra.mxu2 %v236_v2  ;;  %v382_v2 = vld [vmem:[%s659_s12] ss:$0 sm:$0xff] }
  0x2e   :  { %188 = vmatpush.msra.mxu1 %v153_v40  ;;  %v318_v40 = vld [vmem:[#allocation6 + $0x50] sm:$0xff] }
  0x2f   :  { %262 = vmatpush.msra.mxu2 %v235_v3 }
  0x31   :  { %263 = vmatpush.msra.mxu2 %v234_v4 }
  0x32   :  { %109 = vadd.xlane.f32.xlu0 %v108_v16 }
  0x33   :  { %264 = vmatpush.msra.mxu2 %v233_v5 }
  0x35   :  { %265 = vmatpush.msra.mxu2 %v232_v6 }
  0x37   :  { %266 = vmatpush.msra.mxu2 %v231_v7 }
  0x9d   :  { %v107_v29 = vpop.xlane.xlu0 %106 }
  0x9e   :  { %v120_v35 = vperm.slane %v107_v29, %v601_v33 }
  0xa5   :  { %v110_v34 = vpop.xlane.xlu0 %109 }
  0xa6   :  { %v121_v36 = vperm.slane %v110_v34, %v601_v33  ;;  %v315_v33 = vld [vmem:[#allocation6 + $0x38] sm:$0xff] }
  0xa8   :  { %v123_v37 = vsel %vm122_vm1, %v121_v36, %v120_v35  ;;  %v322_v36 = vld [vmem:[#allocation6 + $0x70] sm:$0xff] }
  0xa9   :  { %368 = vmatmul.msk.f32.vlgmr.msra.gmra.mxu0 %vm124_vm2, %v123_v37  ;;  %329 = vmatpush.msra.mxu3 %v322_v36  ;;  %v321_v37 = vld [vmem:[#allocation6 + $0x68] sm:$0xff] }
  0xab   :  { %330 = vmatpush.msra.mxu3 %v321_v37 }
  0xad   :  { %331 = vmatpush.msra.mxu3 %v320_v38 }
  0xaf   :  { %332 = vmatpush.msra.mxu3 %v319_v39 }
  0xb1   :  { %333 = vmatpush.msra.mxu3 %v318_v40 }
 0x126   :  { %v147_v42 = vpop.f32.mrf.mxu0 }
 0x127   :  { %v148_v43 = vadd.f32 %v375_v41, %v147_v42  ;;  %v317_v41 = vld [vmem:[#allocation6 + $0x48] sm:$0xff]  ;;  %v316_v42 = vld [vmem:[#allocation6 + $0x40] sm:$0xff] }
 0x128   :  { %334 = vmatpush.msra.mxu3 %v317_v41 }
 0x129   :  { %vm150_vm3 = vcmp.gt.f32.partialorder %v148_v43, 0.0  ;;  %v151_v44 = vmul.f32 0.1, %v148_v43 }
 0x12a   :  { %335 = vmatpush.msra.mxu3 %v316_v42 }
 0x12b   :  { %v152_v45 = vsel %vm150_vm3, %v148_v43, %v151_v44  ;;  %v314_v43 = vld [vmem:[#allocation6 + $0x30] sm:$0xff]  ;;  %v313_v44 = vld [vmem:[#allocation6 + $0x28] sm:$0xff] }
 0x12c   :  { %189 = vmatmul.f32.vlgmr.msra.gmra.mxu1 %v152_v45  ;;  %336 = vmatpush.msra.mxu3 %v315_v33  ;;  %v312_v45 = vld [vmem:[#allocation6 + $0x20] sm:$0xff] }
 0x12e   :  { %337 = vmatpush.msra.mxu3 %v314_v43 }
 0x130   :  { %338 = vmatpush.msra.mxu3 %v313_v44 }
 0x132   :  { %339 = vmatpush.msra.mxu3 %v312_v45 }
 0x1a9   :  { %v190_v47 = vpop.f32.mrf.mxu1 }
 0x1aa   :  { %v191_v48 = vadd.f32 %v376_v46, %v190_v47  ;;  %v311_v46 = vld [vmem:[#allocation6 + $0x18] sm:$0xff]  ;;  %v310_v47 = vld [vmem:[#allocation6 + $0x10] sm:$0xff] }
 0x1ab   :  { %340 = vmatpush.msra.mxu3 %v311_v46 }
 0x1ac   :  { %v194_v49 = vsel %vm193_vm4, %v191_v48, 0.0 }
 0x1ad   :  { %195 = vadd.xlane.f32.xlu1 %v194_v49  ;;  %341 = vmatpush.msra.mxu3 %v310_v47  ;;  %v308_v49 = vld [vmem:[#allocation6] sm:$0xff] }
 0x220   :  { %v196_v51 = vpop.xlane.xlu1 %195 }
 0x221   :  { %v197_v52 = vmul.f32 0.03125, %v196_v51 }
 0x223   :  { %v198_v53 = vsub.f32 %v191_v48, %v197_v52  ;;  %v309_v48 = vld [vmem:[#allocation6 + $0x8] sm:$0xff] }
 0x224   :  { %342 = vmatpush.msra.mxu3 %v309_v48 }
 0x225   :  { %v202_v54 = vsel %vm199_vm5, %v198_v53, 0.0 }
 0x226   :  { %v203_v55 = vmul.f32 %v202_v54, %v202_v54  ;;  %343 = vmatpush.msra.mxu3 %v308_v49 }
 0x228   :  { %v204_v56 = vsel %vm193_vm4, %v203_v55, 0.0 }
 0x229   :  { %205 = vadd.xlane.f32.xlu1 %v204_v56 }
 0x29c   :  { %v206_v8 = vpop.xlane.xlu1 %205 }
 0x29d   :  { %v207_v9 = vmul.f32 0.03125, %v206_v8 }
 0x29f   :  { %v208_v10 = vadd.f32 1e-05, %v207_v9 }
 0x2a1   :  { %383 = vrsqrt.f32 %v208_v10  ;;  %vm215_vm7 = vweird.f32 %v208_v10 }
 0x2a7   :  { %v384_v11 = vpop.eup %383 }
 0x2a8   :  { %v210_v12 = vmul.f32 %v384_v11, %v208_v10  ;;  %vm216_vm6 = vweird.f32 %v384_v11 }
 0x2a9   :  { %vm217_vm8 = vmor %vm215_vm7, %vm216_vm6 }
 0x2aa   :  { %v211_v13 = vmul.f32 %v384_v11, %v210_v12 }
 0x2ac   :  { %v212_v14 = vmul.f32 0.5, %v211_v13 }
 0x2ae   :  { %v213_v15 = vsub.f32 1.5, %v212_v14 }
 0x2b0   :  { %v214_v16 = vmul.f32 %v384_v11, %v213_v15 }
 0x2b2   :  { %v218_v18 = vsel %vm217_vm8, %v384_v11, %v214_v16 }
 0x2b3   :  { %v219_v19 = vmul.f32 %v218_v18, %v202_v54 }
 0x2b5   :  { %v224_v21 = vmul.f32 %v377_v17, %v219_v19 }
 0x2b7   :  { %v229_v22 = vadd.f32 %v378_v20, %v224_v21 }
 0x2b9   :  { %v230_v23 = vmax.f32 %v229_v22, 0.0 }
 0x2bb   :  { %267 = vmatmul.f32.vlgmr.msra.gmra.mxu2 %v230_v23 }
 0x33e   :  { %v268_v25 = vpop.f32.mrf.mxu2 }
 0x33f   :  { %v269_v26 = vadd.f32 %v379_v24, %v268_v25 }
 0x341   :  { %v271_v27 = vsel %vm193_vm4, %v269_v26, 0.0 }
 0x342   :  { %272 = vadd.xlane.f32.xlu2 %v271_v27 }
 0x3b5   :  { %v273_v29 = vpop.xlane.xlu2 %272 }
 0x3b6   :  { %v274_v30 = vmul.f32 0.0625, %v273_v29 }
 0x3b8   :  { %v275_v31 = vsub.f32 %v269_v26, %v274_v30 }
 0x3ba   :  { %v279_v32 = vsel %vm276_vm9, %v275_v31, 0.0 }
 0x3bb   :  { %v280_v34 = vmul.f32 %v279_v32, %v279_v32 }
 0x3bd   :  { %v281_v35 = vsel %vm193_vm4, %v280_v34, 0.0 }
 0x3be   :  { %282 = vadd.xlane.f32.xlu2 %v281_v35 }
 0x431   :  { %v283_v50 = vpop.xlane.xlu2 %282 }
 0x432   :  { %v284_v51 = vmul.f32 0.0625, %v283_v50 }
 0x434   :  { %v285_v52 = vadd.f32 1e-05, %v284_v51 }
 0x436   :  { %385 = vrsqrt.f32 %v285_v52  ;;  %vm292_vm11 = vweird.f32 %v285_v52 }
 0x43c   :  { %v386_v53 = vpop.eup %385 }
 0x43d   :  { %v287_v54 = vmul.f32 %v386_v53, %v285_v52  ;;  %vm293_vm10 = vweird.f32 %v386_v53 }
 0x43e   :  { %vm294_vm12 = vmor %vm292_vm11, %vm293_vm10 }
 0x43f   :  { %v288_v55 = vmul.f32 %v386_v53, %v287_v54 }
 0x441   :  { %v289_v56 = vmul.f32 0.5, %v288_v55 }
 0x443   :  { %v290_v57 = vsub.f32 1.5, %v289_v56 }
 0x445   :  { %v291_v58 = vmul.f32 %v386_v53, %v290_v57 }
 0x447   :  { %v295_v60 = vsel %vm294_vm12, %v386_v53, %v291_v58 }
 0x448   :  { %v296_v61 = vmul.f32 %v295_v60, %v279_v32 }
 0x44a   :  { %v301_v63 = vmul.f32 %v380_v59, %v296_v61 }
 0x44c   :  { %v306_v0 = vadd.f32 %v381_v62, %v301_v63 }
 0x44e   :  { %v307_v1 = vmax.f32 %v306_v0, 0.0 }
 0x450   :  { %344 = vmatmul.f32.vlgmr.msra.gmra.mxu3 %v307_v1 }
 0x4d3   :  { %v345_v3 = vpop.f32.mrf.mxu3 }
 0x4d4   :  { %v346_v4 = vadd.f32 %v382_v2, %v345_v3 }
 0x4d6   :  { %348 = vst [vmem:[#allocation8] sm:$0x3] %v346_v4 }
 0x4d7   :  { %359 = dma.vmem_to_hbm [thread:$0]  %s355_s0, 32, %s357_s9, [#allocation5]  }
 0x4d8   :  { %463 = dma.done.wait [#allocation5], 32  }
 0x4d9   :  { %464 = vsyncadd [#allocation5], 4294967264 }
 0x4da   :  { %364 = vsyncpa [#allocation4], 1 }
 0x4db   :  { %365 = vsyncpa [#allocation7], 1 }
 0x4dc   :  { %366 = vsyncpa [#allocation5], 1 }

</bundles_post_ra>
